<compile_context>
chip_gen: v7x
topology: tpu7x:2x2x1
jax: 0.10.0
libtpu: 0.0.40
codegen_flags: <defaults>
</compile_context>

<pallas_src>
import functools
import math

import jax
import jax.numpy as jnp
from jax.experimental import pallas as pl
from jax.experimental.pallas import tpu as pltpu

NUM_CLASSES = 10
IN_CHANNELS = 1
LANE = 128


def _round_up(n, m):
    return -(-n // m) * m


def _compiler_params(block_bytes, n_parallel_axes=1):
    # generous but explicit scoped-VMEM cap: 2x-buffered blocks + headroom
    limit = int(min(max(4 * block_bytes + (4 << 20), 16 << 20), 64 << 20))
    return pltpu.CompilerParams(
        dimension_semantics=("parallel",) * n_parallel_axes,
        vmem_limit_bytes=limit)


# ---------------------------------------------------------------------------
# Fused conv3x3(pad=1) + bias + ReLU + maxpool2x2 kernel (one batch element)
# ---------------------------------------------------------------------------
def _conv3x3_relu_pool_kernel(p00, p01, p10, p11, w_ref, b_ref, o_ref, *, h, w):
    """p{py}{px}: (Cin, Lpad) zero-padded input parity plane, flattened
                  row-major with padded width (w + 2) plus a small zero tail.
       w_ref:     (Cout, 9*Cin), columns ordered (ky, kx, ci).
       b_ref:     (Cout, 1).
       o_ref:     (Cout, h*(w+2)) pooled output; the 2 garbage columns per
                  row of width (w+2) are stripped by host-side glue."""
    planes = ((p00, p01), (p10, p11))
    lo = h * (w + 2)
    wm = w_ref[...]
    m = None
    for qy in range(2):            # output-row parity (static, unrolled)
        for qx in range(2):        # output-col parity
            pieces = []
            for ky in range(3):
                for kx in range(3):
                    ay, ax = qy + ky - 1, qx + kx - 1
                    src = planes[ay % 2][ax % 2]
                    start = (ay // 2 + 1) * (w + 2) + (ax // 2 + 1)
                    pieces.append(src[:, start:start + lo])        # (Cin, lo)
            xcat = jnp.concatenate(pieces, axis=0)                 # (9*Cin, lo)
            acc = jnp.dot(wm, xcat, preferred_element_type=jnp.float32)
            m = acc if m is None else jnp.maximum(m, acc)
    # bias-add and ReLU commute with the 2x2 max (monotone): apply once.
    o_ref[...] = jnp.maximum(m + b_ref[...], 0.0).astype(o_ref.dtype)


def conv3x3_relu_pool(planes, w_mat, b_col, *, H, W):
    B, cin, lpad = planes[0].shape
    cout = w_mat.shape[0]
    h, w = H // 2, W // 2
    lo = h * (w + 2)

    kernel = functools.partial(_conv3x3_relu_pool_kernel, h=h, w=w)
    block_bytes = 4 * (4 * cin * lpad + cout * lo + cout * 9 * cin + cout
                       + 9 * cin * lo + 4 * cout * lo)
    flops = 2 * B * 4 * cout * 9 * cin * lo
    bytes_accessed = 4 * (B * (4 * cin * lpad + cout * lo) + cout * (9 * cin + 1))

    in_specs = [pl.BlockSpec((None, cin, lpad), lambda b: (b, 0, 0))
                for _ in range(4)]
    in_specs += [pl.BlockSpec((cout, 9 * cin), lambda b: (0, 0)),
                 pl.BlockSpec((cout, 1), lambda b: (0, 0))]

    return pl.pallas_call(
        kernel,
        out_shape=jax.ShapeDtypeStruct((B, cout, lo), planes[0].dtype),
        grid=(B,),
        in_specs=in_specs,
        out_specs=pl.BlockSpec((None, cout, lo), lambda b: (b, 0, 0)),
        compiler_params=_compiler_params(block_bytes),
        cost_estimate=pl.CostEstimate(flops=flops, transcendentals=0,
                                      bytes_accessed=bytes_accessed),
    )(*planes, w_mat, b_col)


# ---------------------------------------------------------------------------
# Linear (fc) kernel: y = x @ W + b, M tiled, N padded to 128 lanes
# ---------------------------------------------------------------------------
def _linear_kernel(x_ref, w_ref, b_ref, o_ref):
    o_ref[...] = (jnp.dot(x_ref[...], w_ref[...],
                          preferred_element_type=jnp.float32)
                  + b_ref[...]).astype(o_ref.dtype)


def pallas_linear(x, w, b, *, tm=256):
    M, K = x.shape
    K2, N = w.shape
    assert K == K2 and b.shape == (1, N)
    tm = min(tm, M)
    block_bytes = 4 * (tm * K + K * N + N + tm * N)
    return pl.pallas_call(
        _linear_kernel,
        out_shape=jax.ShapeDtypeStruct((M, N), x.dtype),
        grid=(pl.cdiv(M, tm),),
        in_specs=[pl.BlockSpec((tm, K), lambda i: (i, 0)),
                  pl.BlockSpec((K, N), lambda i: (0, 0)),
                  pl.BlockSpec((1, N), lambda i: (0, 0))],
        out_specs=pl.BlockSpec((tm, N), lambda i: (i, 0)),
        compiler_params=_compiler_params(block_bytes),
        cost_estimate=pl.CostEstimate(
            flops=2 * M * K * N, transcendentals=0,
            bytes_accessed=4 * (M * K + K * N + N + M * N)),
    )(x, w, b)


# ---------------------------------------------------------------------------
# Plain-JAX glue (quarter-res tensors only: parity split + pad + flatten)
# ---------------------------------------------------------------------------
def split_pad_flatten(x):
    """(B, C, H, W) -> four parity planes (B, C, Lpad): space-to-depth 2x2,
    each half-res plane zero-padded by 1, flattened row-major with padded
    width (w+2), plus a zero tail so in-kernel flat shifts stay in bounds."""
    B, C, H, W = x.shape
    assert H % 2 == 0 and W % 2 == 0
    h, w = H // 2, W // 2
    lp = (h + 2) * (w + 2)
    lpad = _round_up(lp + 2, LANE)
    planes = []
    for qy in range(2):
        for qx in range(2):
            p = x[:, :, qy::2, qx::2]
            p = jnp.pad(p, ((0, 0), (0, 0), (1, 1), (1, 1)))
            p = p.reshape(B, C, lp)
            p = jnp.pad(p, ((0, 0), (0, 0), (0, lpad - lp)))
            planes.append(p)
    return planes


def strip_garbage(y, h, w):
    """(B, C, h*(w+2)) -> (B, C, h, w): drop the 2 garbage columns per row."""
    B, C, _ = y.shape
    return y.reshape(B, C, h, w + 2)[:, :, :, :w]


# ---------------------------------------------------------------------------
# Parameters (PyTorch-default-style init) + one-time layout preparation
# ---------------------------------------------------------------------------
def init_params(key, in_channels=IN_CHANNELS, out_channels=NUM_CLASSES):
    ks = jax.random.split(key, 6)

    def u(k, shape, fan_in):
        bound = 1.0 / math.sqrt(fan_in)
        return jax.random.uniform(k, shape, jnp.float32, -bound, bound)

    return {
        "w1": u(ks[0], (8, in_channels, 3, 3), in_channels * 9),
        "b1": u(ks[1], (8,), in_channels * 9),
        "w2": u(ks[2], (16, 8, 3, 3), 8 * 9),
        "b2": u(ks[3], (16,), 8 * 9),
        "wfc": u(ks[4], (out_channels, 16 * 7 * 7), 16 * 7 * 7),
        "bfc": u(ks[5], (out_channels,), 16 * 7 * 7),
    }


def prepare_params(p):
    """One-time conversion of PyTorch-layout params to kernel layouts."""
    n = p["wfc"].shape[0]
    npad = _round_up(n, LANE)
    return {
        # conv weights -> (Cout, 9*Cin), columns ordered (ky, kx, ci)
        "w1": p["w1"].transpose(0, 2, 3, 1).reshape(p["w1"].shape[0], -1),
        "b1": p["b1"].reshape(-1, 1),
        "w2": p["w2"].transpose(0, 2, 3, 1).reshape(p["w2"].shape[0], -1),
        "b2": p["b2"].reshape(-1, 1),
        # fc weight pre-transposed + zero-padded to a full 128-lane output
        "wfc": jnp.pad(p["wfc"].T, ((0, 0), (0, npad - n))),
        "bfc": jnp.pad(p["bfc"].reshape(1, -1), ((0, 0), (0, npad - n))),
    }


# ---------------------------------------------------------------------------
# Forward pass (semantics identical to the PyTorch CNN.forward)
# ---------------------------------------------------------------------------
@jax.jit
def cnn_forward(kparams, x):
    B, _, H, W = x.shape                               # (B, 1, 28, 28)
    y = conv3x3_relu_pool(split_pad_flatten(x),
                          kparams["w1"], kparams["b1"], H=H, W=W)
    a = strip_garbage(y, H // 2, W // 2)               # (B,  8, 14, 14)
    y = conv3x3_relu_pool(split_pad_flatten(a),
                          kparams["w2"], kparams["b2"], H=H // 2, W=W // 2)
    a = strip_garbage(y, H // 4, W // 4)               # (B, 16,  7,  7)
    flat = a.reshape(B, -1)                            # NCHW flatten == torch .view
    logits = pallas_linear(flat, kparams["wfc"], kparams["bfc"])
    return logits[:, :NUM_CLASSES]


# ---------------------------------------------------------------------------
# Pure-JAX reference (for correctness verification only)
# ---------------------------------------------------------------------------
def cnn_reference(params, x):
    def conv(v, w, b):
        y = jax.lax.conv_general_dilated(
            v, w, window_strides=(1, 1), padding=((1, 1), (1, 1)),
            dimension_numbers=("NCHW", "OIHW", "NCHW"))
        return y + b.reshape(1, -1, 1, 1)

    def pool(v):
        return jax.lax.reduce_window(v, -jnp.inf, jax.lax.max,
                                     (1, 1, 2, 2), (1, 1, 2, 2), "VALID")

    h = pool(jax.nn.relu(conv(x, params["w1"], params["b1"])))
    h = pool(jax.nn.relu(conv(h, params["w2"], params["b2"])))
    h = h.reshape(h.shape[0], -1)
    return h @ params["wfc"].T + params["bfc"]


if __name__ == "__main__":
    key = jax.random.PRNGKey(0)
    k_params, k_x = jax.random.split(key)
    params = init_params(k_params)          # PyTorch-style layouts
    kparams = prepare_params(params)        # kernel layouts (done once)

    x = jax.random.normal(k_x, (2, 1, 28, 28), jnp.float32)
    out = cnn_forward(kparams, x)
    jax.block_until_ready(out)
    assert out.shape == (2, NUM_CLASSES) and out.dtype == jnp.float32

    ref = cnn_reference(params, x)
    assert jnp.allclose(out, ref, atol=1e-4, rtol=1e-4), \
        float(jnp.max(jnp.abs(out - ref)))
    print("KERNEL_OK")
</pallas_src>

<mosaic_0001>
module attributes {stable_mosaic.version = 11 : i64} {
  func.func @_conv3x3_relu_pool_kernel(%arg0: i32, %arg1: memref<1x1x384xf32, #tpu.memory_space<vmem>>, %arg2: memref<1x1x384xf32, #tpu.memory_space<vmem>>, %arg3: memref<1x1x384xf32, #tpu.memory_space<vmem>>, %arg4: memref<1x1x384xf32, #tpu.memory_space<vmem>>, %arg5: memref<8x9xf32, #tpu.memory_space<vmem>>, %arg6: memref<8x1xf32, #tpu.memory_space<vmem>>, %arg7: memref<1x8x224xf32, #tpu.memory_space<vmem>>) attributes {dimension_semantics = [#tpu.dimension_semantics<parallel>], iteration_bounds = array<i64: 2>, scalar_prefetch = 0 : i64, scratch_operands = 0 : i64, tpu.core_type = #tpu.core_type<tc>, window_params = [{transform_indices = @transform_0, window_bounds = array<i64: 1, 1, 384>}, {transform_indices = @transform_1, window_bounds = array<i64: 1, 1, 384>}, {transform_indices = @transform_2, window_bounds = array<i64: 1, 1, 384>}, {transform_indices = @transform_3, window_bounds = array<i64: 1, 1, 384>}, {pipeline_mode = #tpu.pipeline_mode<synchronous>, transform_indices = @transform_4, window_bounds = array<i64: 8, 9>}, {pipeline_mode = #tpu.pipeline_mode<synchronous>, transform_indices = @transform_5, window_bounds = array<i64: 8, 1>}, {transform_indices = @transform_6, window_bounds = array<i64: 1, 8, 224>}]} {
    %c0 = arith.constant 0 : index
    %c0_0 = arith.constant 0 : index
    %0 = vector.load %arg5[%c0, %c0_0] : memref<8x9xf32, #tpu.memory_space<vmem>>, vector<8x9xf32>
    %c0_1 = arith.constant 0 : index
    %c0_2 = arith.constant 0 : index
    %c0_3 = arith.constant 0 : index
    %1 = vector.load %arg4[%c0_1, %c0_2, %c0_3] : memref<1x1x384xf32, #tpu.memory_space<vmem>>, vector<1x1x224xf32>
    %2 = vector.shape_cast %1 : vector<1x1x224xf32> to vector<1x224xf32>
    %c0_4 = arith.constant 0 : index
    %c0_5 = arith.constant 0 : index
    %c1 = arith.constant 1 : index
    %3 = vector.load %arg3[%c0_4, %c0_5, %c1] : memref<1x1x384xf32, #tpu.memory_space<vmem>>, vector<1x1x224xf32>
    %4 = vector.shape_cast %3 : vector<1x1x224xf32> to vector<1x224xf32>
    %c0_6 = arith.constant 0 : index
    %c0_7 = arith.constant 0 : index
    %c1_8 = arith.constant 1 : index
    %5 = vector.load %arg4[%c0_6, %c0_7, %c1_8] : memref<1x1x384xf32, #tpu.memory_space<vmem>>, vector<1x1x224xf32>
    %6 = vector.shape_cast %5 : vector<1x1x224xf32> to vector<1x224xf32>
    %c0_9 = arith.constant 0 : index
    %c0_10 = arith.constant 0 : index
    %c16 = arith.constant 16 : index
    %7 = vector.load %arg2[%c0_9, %c0_10, %c16] : memref<1x1x384xf32, #tpu.memory_space<vmem>>, vector<1x1x224xf32>
    %8 = vector.shape_cast %7 : vector<1x1x224xf32> to vector<1x224xf32>
    %c0_11 = arith.constant 0 : index
    %c0_12 = arith.constant 0 : index
    %c17 = arith.constant 17 : index
    %9 = vector.load %arg1[%c0_11, %c0_12, %c17] : memref<1x1x384xf32, #tpu.memory_space<vmem>>, vector<1x1x224xf32>
    %10 = vector.shape_cast %9 : vector<1x1x224xf32> to vector<1x224xf32>
    %c0_13 = arith.constant 0 : index
    %c0_14 = arith.constant 0 : index
    %c17_15 = arith.constant 17 : index
    %11 = vector.load %arg2[%c0_13, %c0_14, %c17_15] : memref<1x1x384xf32, #tpu.memory_space<vmem>>, vector<1x1x224xf32>
    %12 = vector.shape_cast %11 : vector<1x1x224xf32> to vector<1x224xf32>
    %c0_16 = arith.constant 0 : index
    %c0_17 = arith.constant 0 : index
    %c16_18 = arith.constant 16 : index
    %13 = vector.load %arg4[%c0_16, %c0_17, %c16_18] : memref<1x1x384xf32, #tpu.memory_space<vmem>>, vector<1x1x224xf32>
    %14 = vector.shape_cast %13 : vector<1x1x224xf32> to vector<1x224xf32>
    %c0_19 = arith.constant 0 : index
    %c0_20 = arith.constant 0 : index
    %c17_21 = arith.constant 17 : index
    %15 = vector.load %arg3[%c0_19, %c0_20, %c17_21] : memref<1x1x384xf32, #tpu.memory_space<vmem>>, vector<1x1x224xf32>
    %16 = vector.shape_cast %15 : vector<1x1x224xf32> to vector<1x224xf32>
    %c0_22 = arith.constant 0 : index
    %c0_23 = arith.constant 0 : index
    %c17_24 = arith.constant 17 : index
    %17 = vector.load %arg4[%c0_22, %c0_23, %c17_24] : memref<1x1x384xf32, #tpu.memory_space<vmem>>, vector<1x1x224xf32>
    %18 = vector.shape_cast %17 : vector<1x1x224xf32> to vector<1x224xf32>
    %19 = tpu.concatenate %2, %4, %6, %8, %10, %12, %14, %16, %18 in 0 : vector<1x224xf32>, vector<1x224xf32>, vector<1x224xf32>, vector<1x224xf32>, vector<1x224xf32>, vector<1x224xf32>, vector<1x224xf32>, vector<1x224xf32>, vector<1x224xf32> -> vector<9x224xf32>
    %cst = arith.constant dense<0.000000e+00> : vector<8x224xf32>
    %20 = tpu.matmul %0, %19, %cst {dimension_numbers = #tpu.dot_dimension_numbers<[1], [0], [0], [1], [0, 0, 1, 1], [], []>} : vector<8x9xf32>, vector<9x224xf32>, vector<8x224xf32> -> vector<8x224xf32>
    %c0_25 = arith.constant 0 : index
    %c0_26 = arith.constant 0 : index
    %c1_27 = arith.constant 1 : index
    %21 = vector.load %arg3[%c0_25, %c0_26, %c1_27] : memref<1x1x384xf32, #tpu.memory_space<vmem>>, vector<1x1x224xf32>
    %22 = vector.shape_cast %21 : vector<1x1x224xf32> to vector<1x224xf32>
    %c0_28 = arith.constant 0 : index
    %c0_29 = arith.constant 0 : index
    %c1_30 = arith.constant 1 : index
    %23 = vector.load %arg4[%c0_28, %c0_29, %c1_30] : memref<1x1x384xf32, #tpu.memory_space<vmem>>, vector<1x1x224xf32>
    %24 = vector.shape_cast %23 : vector<1x1x224xf32> to vector<1x224xf32>
    %c0_31 = arith.constant 0 : index
    %c0_32 = arith.constant 0 : index
    %c2 = arith.constant 2 : index
    %25 = vector.load %arg3[%c0_31, %c0_32, %c2] : memref<1x1x384xf32, #tpu.memory_space<vmem>>, vector<1x1x224xf32>
    %26 = vector.shape_cast %25 : vector<1x1x224xf32> to vector<1x224xf32>
    %c0_33 = arith.constant 0 : index
    %c0_34 = arith.constant 0 : index
    %c17_35 = arith.constant 17 : index
    %27 = vector.load %arg1[%c0_33, %c0_34, %c17_35] : memref<1x1x384xf32, #tpu.memory_space<vmem>>, vector<1x1x224xf32>
    %28 = vector.shape_cast %27 : vector<1x1x224xf32> to vector<1x224xf32>
    %c0_36 = arith.constant 0 : index
    %c0_37 = arith.constant 0 : index
    %c17_38 = arith.constant 17 : index
    %29 = vector.load %arg2[%c0_36, %c0_37, %c17_38] : memref<1x1x384xf32, #tpu.memory_space<vmem>>, vector<1x1x224xf32>
    %30 = vector.shape_cast %29 : vector<1x1x224xf32> to vector<1x224xf32>
    %c0_39 = arith.constant 0 : index
    %c0_40 = arith.constant 0 : index
    %c18 = arith.constant 18 : index
    %31 = vector.load %arg1[%c0_39, %c0_40, %c18] : memref<1x1x384xf32, #tpu.memory_space<vmem>>, vector<1x1x224xf32>
    %32 = vector.shape_cast %31 : vector<1x1x224xf32> to vector<1x224xf32>
    %c0_41 = arith.constant 0 : index
    %c0_42 = arith.constant 0 : index
    %c17_43 = arith.constant 17 : index
    %33 = vector.load %arg3[%c0_41, %c0_42, %c17_43] : memref<1x1x384xf32, #tpu.memory_space<vmem>>, vector<1x1x224xf32>
    %34 = vector.shape_cast %33 : vector<1x1x224xf32> to vector<1x224xf32>
    %c0_44 = arith.constant 0 : index
    %c0_45 = arith.constant 0 : index
    %c17_46 = arith.constant 17 : index
    %35 = vector.load %arg4[%c0_44, %c0_45, %c17_46] : memref<1x1x384xf32, #tpu.memory_space<vmem>>, vector<1x1x224xf32>
    %36 = vector.shape_cast %35 : vector<1x1x224xf32> to vector<1x224xf32>
    %c0_47 = arith.constant 0 : index
    %c0_48 = arith.constant 0 : index
    %c18_49 = arith.constant 18 : index
    %37 = vector.load %arg3[%c0_47, %c0_48, %c18_49] : memref<1x1x384xf32, #tpu.memory_space<vmem>>, vector<1x1x224xf32>
    %38 = vector.shape_cast %37 : vector<1x1x224xf32> to vector<1x224xf32>
    %39 = tpu.concatenate %22, %24, %26, %28, %30, %32, %34, %36, %38 in 0 : vector<1x224xf32>, vector<1x224xf32>, vector<1x224xf32>, vector<1x224xf32>, vector<1x224xf32>, vector<1x224xf32>, vector<1x224xf32>, vector<1x224xf32>, vector<1x224xf32> -> vector<9x224xf32>
    %cst_50 = arith.constant dense<0.000000e+00> : vector<8x224xf32>
    %40 = tpu.matmul %0, %39, %cst_50 {dimension_numbers = #tpu.dot_dimension_numbers<[1], [0], [0], [1], [0, 0, 1, 1], [], []>} : vector<8x9xf32>, vector<9x224xf32>, vector<8x224xf32> -> vector<8x224xf32>
    %41 = arith.maximumf %20, %40 : vector<8x224xf32>
    %c0_51 = arith.constant 0 : index
    %c0_52 = arith.constant 0 : index
    %c16_53 = arith.constant 16 : index
    %42 = vector.load %arg2[%c0_51, %c0_52, %c16_53] : memref<1x1x384xf32, #tpu.memory_space<vmem>>, vector<1x1x224xf32>
    %43 = vector.shape_cast %42 : vector<1x1x224xf32> to vector<1x224xf32>
    %c0_54 = arith.constant 0 : index
    %c0_55 = arith.constant 0 : index
    %c17_56 = arith.constant 17 : index
    %44 = vector.load %arg1[%c0_54, %c0_55, %c17_56] : memref<1x1x384xf32, #tpu.memory_space<vmem>>, vector<1x1x224xf32>
    %45 = vector.shape_cast %44 : vector<1x1x224xf32> to vector<1x224xf32>
    %c0_57 = arith.constant 0 : index
    %c0_58 = arith.constant 0 : index
    %c17_59 = arith.constant 17 : index
    %46 = vector.load %arg2[%c0_57, %c0_58, %c17_59] : memref<1x1x384xf32, #tpu.memory_space<vmem>>, vector<1x1x224xf32>
    %47 = vector.shape_cast %46 : vector<1x1x224xf32> to vector<1x224xf32>
    %c0_60 = arith.constant 0 : index
    %c0_61 = arith.constant 0 : index
    %c16_62 = arith.constant 16 : index
    %48 = vector.load %arg4[%c0_60, %c0_61, %c16_62] : memref<1x1x384xf32, #tpu.memory_space<vmem>>, vector<1x1x224xf32>
    %49 = vector.shape_cast %48 : vector<1x1x224xf32> to vector<1x224xf32>
    %c0_63 = arith.constant 0 : index
    %c0_64 = arith.constant 0 : index
    %c17_65 = arith.constant 17 : index
    %50 = vector.load %arg3[%c0_63, %c0_64, %c17_65] : memref<1x1x384xf32, #tpu.memory_space<vmem>>, vector<1x1x224xf32>
    %51 = vector.shape_cast %50 : vector<1x1x224xf32> to vector<1x224xf32>
    %c0_66 = arith.constant 0 : index
    %c0_67 = arith.constant 0 : index
    %c17_68 = arith.constant 17 : index
    %52 = vector.load %arg4[%c0_66, %c0_67, %c17_68] : memref<1x1x384xf32, #tpu.memory_space<vmem>>, vector<1x1x224xf32>
    %53 = vector.shape_cast %52 : vector<1x1x224xf32> to vector<1x224xf32>
    %c0_69 = arith.constant 0 : index
    %c0_70 = arith.constant 0 : index
    %c32 = arith.constant 32 : index
    %54 = vector.load %arg2[%c0_69, %c0_70, %c32] : memref<1x1x384xf32, #tpu.memory_space<vmem>>, vector<1x1x224xf32>
    %55 = vector.shape_cast %54 : vector<1x1x224xf32> to vector<1x224xf32>
    %c0_71 = arith.constant 0 : index
    %c0_72 = arith.constant 0 : index
    %c33 = arith.constant 33 : index
    %56 = vector.load %arg1[%c0_71, %c0_72, %c33] : memref<1x1x384xf32, #tpu.memory_space<vmem>>, vector<1x1x224xf32>
    %57 = vector.shape_cast %56 : vector<1x1x224xf32> to vector<1x224xf32>
    %c0_73 = arith.constant 0 : index
    %c0_74 = arith.constant 0 : index
    %c33_75 = arith.constant 33 : index
    %58 = vector.load %arg2[%c0_73, %c0_74, %c33_75] : memref<1x1x384xf32, #tpu.memory_space<vmem>>, vector<1x1x224xf32>
    %59 = vector.shape_cast %58 : vector<1x1x224xf32> to vector<1x224xf32>
    %60 = tpu.concatenate %43, %45, %47, %49, %51, %53, %55, %57, %59 in 0 : vector<1x224xf32>, vector<1x224xf32>, vector<1x224xf32>, vector<1x224xf32>, vector<1x224xf32>, vector<1x224xf32>, vector<1x224xf32>, vector<1x224xf32>, vector<1x224xf32> -> vector<9x224xf32>
    %cst_76 = arith.constant dense<0.000000e+00> : vector<8x224xf32>
    %61 = tpu.matmul %0, %60, %cst_76 {dimension_numbers = #tpu.dot_dimension_numbers<[1], [0], [0], [1], [0, 0, 1, 1], [], []>} : vector<8x9xf32>, vector<9x224xf32>, vector<8x224xf32> -> vector<8x224xf32>
    %62 = arith.maximumf %41, %61 : vector<8x224xf32>
    %c0_77 = arith.constant 0 : index
    %c0_78 = arith.constant 0 : index
    %c17_79 = arith.constant 17 : index
    %63 = vector.load %arg1[%c0_77, %c0_78, %c17_79] : memref<1x1x384xf32, #tpu.memory_space<vmem>>, vector<1x1x224xf32>
    %64 = vector.shape_cast %63 : vector<1x1x224xf32> to vector<1x224xf32>
    %c0_80 = arith.constant 0 : index
    %c0_81 = arith.constant 0 : index
    %c17_82 = arith.constant 17 : index
    %65 = vector.load %arg2[%c0_80, %c0_81, %c17_82] : memref<1x1x384xf32, #tpu.memory_space<vmem>>, vector<1x1x224xf32>
    %66 = vector.shape_cast %65 : vector<1x1x224xf32> to vector<1x224xf32>
    %c0_83 = arith.constant 0 : index
    %c0_84 = arith.constant 0 : index
    %c18_85 = arith.constant 18 : index
    %67 = vector.load %arg1[%c0_83, %c0_84, %c18_85] : memref<1x1x384xf32, #tpu.memory_space<vmem>>, vector<1x1x224xf32>
    %68 = vector.shape_cast %67 : vector<1x1x224xf32> to vector<1x224xf32>
    %c0_86 = arith.constant 0 : index
    %c0_87 = arith.constant 0 : index
    %c17_88 = arith.constant 17 : index
    %69 = vector.load %arg3[%c0_86, %c0_87, %c17_88] : memref<1x1x384xf32, #tpu.memory_space<vmem>>, vector<1x1x224xf32>
    %70 = vector.shape_cast %69 : vector<1x1x224xf32> to vector<1x224xf32>
    %c0_89 = arith.constant 0 : index
    %c0_90 = arith.constant 0 : index
    %c17_91 = arith.constant 17 : index
    %71 = vector.load %arg4[%c0_89, %c0_90, %c17_91] : memref<1x1x384xf32, #tpu.memory_space<vmem>>, vector<1x1x224xf32>
    %72 = vector.shape_cast %71 : vector<1x1x224xf32> to vector<1x224xf32>
    %c0_92 = arith.constant 0 : index
    %c0_93 = arith.constant 0 : index
    %c18_94 = arith.constant 18 : index
    %73 = vector.load %arg3[%c0_92, %c0_93, %c18_94] : memref<1x1x384xf32, #tpu.memory_space<vmem>>, vector<1x1x224xf32>
    %74 = vector.shape_cast %73 : vector<1x1x224xf32> to vector<1x224xf32>
    %c0_95 = arith.constant 0 : index
    %c0_96 = arith.constant 0 : index
    %c33_97 = arith.constant 33 : index
    %75 = vector.load %arg1[%c0_95, %c0_96, %c33_97] : memref<1x1x384xf32, #tpu.memory_space<vmem>>, vector<1x1x224xf32>
    %76 = vector.shape_cast %75 : vector<1x1x224xf32> to vector<1x224xf32>
    %c0_98 = arith.constant 0 : index
    %c0_99 = arith.constant 0 : index
    %c33_100 = arith.constant 33 : index
    %77 = vector.load %arg2[%c0_98, %c0_99, %c33_100] : memref<1x1x384xf32, #tpu.memory_space<vmem>>, vector<1x1x224xf32>
    %78 = vector.shape_cast %77 : vector<1x1x224xf32> to vector<1x224xf32>
    %c0_101 = arith.constant 0 : index
    %c0_102 = arith.constant 0 : index
    %c34 = arith.constant 34 : index
    %79 = vector.load %arg1[%c0_101, %c0_102, %c34] : memref<1x1x384xf32, #tpu.memory_space<vmem>>, vector<1x1x224xf32>
    %80 = vector.shape_cast %79 : vector<1x1x224xf32> to vector<1x224xf32>
    %81 = tpu.concatenate %64, %66, %68, %70, %72, %74, %76, %78, %80 in 0 : vector<1x224xf32>, vector<1x224xf32>, vector<1x224xf32>, vector<1x224xf32>, vector<1x224xf32>, vector<1x224xf32>, vector<1x224xf32>, vector<1x224xf32>, vector<1x224xf32> -> vector<9x224xf32>
    %cst_103 = arith.constant dense<0.000000e+00> : vector<8x224xf32>
    %82 = tpu.matmul %0, %81, %cst_103 {dimension_numbers = #tpu.dot_dimension_numbers<[1], [0], [0], [1], [0, 0, 1, 1], [], []>} : vector<8x9xf32>, vector<9x224xf32>, vector<8x224xf32> -> vector<8x224xf32>
    %83 = arith.maximumf %62, %82 : vector<8x224xf32>
    %c0_104 = arith.constant 0 : index
    %c0_105 = arith.constant 0 : index
    %84 = vector.load %arg6[%c0_104, %c0_105] : memref<8x1xf32, #tpu.memory_space<vmem>>, vector<8x1xf32>
    %85 = vector.broadcast %84 : vector<8x1xf32> to vector<8x224xf32>
    %86 = arith.addf %83, %85 : vector<8x224xf32>
    %cst_106 = arith.constant 0.000000e+00 : f32
    %87 = vector.broadcast %cst_106 : f32 to vector<8x224xf32>
    %88 = arith.maximumf %86, %87 : vector<8x224xf32>
    %c0_107 = arith.constant 0 : index
    %c0_108 = arith.constant 0 : index
    %c0_109 = arith.constant 0 : index
    %89 = vector.load %arg7[%c0_107, %c0_108, %c0_109] : memref<1x8x224xf32, #tpu.memory_space<vmem>>, vector<1x8x224xf32>
    %90 = vector.shape_cast %89 : vector<1x8x224xf32> to vector<8x224xf32>
    %91 = vector.shape_cast %88 : vector<8x224xf32> to vector<1x8x224xf32>
    tpu.vector_store %arg7[%c0_107, %c0_108, %c0_109], %91 {strides = array<i32>} : memref<1x8x224xf32, #tpu.memory_space<vmem>>, vector<1x8x224xf32>,
    return
  }
  func.func @transform_0(%arg0: i32) -> (i32, i32, i32) {
    %c0_i32 = arith.constant 0 : i32
    %c0_i32_0 = arith.constant 0 : i32
    %c0_i32_1 = arith.constant 0 : i32
    return %arg0, %c0_i32, %c0_i32_0 : i32, i32, i32
  }
  func.func @transform_1(%arg0: i32) -> (i32, i32, i32) {
    %c0_i32 = arith.constant 0 : i32
    %c0_i32_0 = arith.constant 0 : i32
    %c0_i32_1 = arith.constant 0 : i32
    return %arg0, %c0_i32, %c0_i32_0 : i32, i32, i32
  }
  func.func @transform_2(%arg0: i32) -> (i32, i32, i32) {
    %c0_i32 = arith.constant 0 : i32
    %c0_i32_0 = arith.constant 0 : i32
    %c0_i32_1 = arith.constant 0 : i32
    return %arg0, %c0_i32, %c0_i32_0 : i32, i32, i32
  }
  func.func @transform_3(%arg0: i32) -> (i32, i32, i32) {
    %c0_i32 = arith.constant 0 : i32
    %c0_i32_0 = arith.constant 0 : i32
    %c0_i32_1 = arith.constant 0 : i32
    return %arg0, %c0_i32, %c0_i32_0 : i32, i32, i32
  }
  func.func @transform_4(%arg0: i32) -> (i32, i32) {
    %c0_i32 = arith.constant 0 : i32
    %c0_i32_0 = arith.constant 0 : i32
    %c0_i32_1 = arith.constant 0 : i32
    return %c0_i32, %c0_i32_0 : i32, i32
  }
  func.func @transform_5(%arg0: i32) -> (i32, i32) {
    %c0_i32 = arith.constant 0 : i32
    %c0_i32_0 = arith.constant 0 : i32
    %c0_i32_1 = arith.constant 0 : i32
    return %c0_i32, %c0_i32_0 : i32, i32
  }
  func.func @transform_6(%arg0: i32) -> (i32, i32, i32) {
    %c0_i32 = arith.constant 0 : i32
    %c0_i32_0 = arith.constant 0 : i32
    %c0_i32_1 = arith.constant 0 : i32
    return %arg0, %c0_i32, %c0_i32_0 : i32, i32, i32
  }
}

module attributes {stable_mosaic.version = 11 : i64} {
  func.func @_conv3x3_relu_pool_kernel(%arg0: i32, %arg1: memref<1x8x128xf32, #tpu.memory_space<vmem>>, %arg2: memref<1x8x128xf32, #tpu.memory_space<vmem>>, %arg3: memref<1x8x128xf32, #tpu.memory_space<vmem>>, %arg4: memref<1x8x128xf32, #tpu.memory_space<vmem>>, %arg5: memref<16x72xf32, #tpu.memory_space<vmem>>, %arg6: memref<16x1xf32, #tpu.memory_space<vmem>>, %arg7: memref<1x16x63xf32, #tpu.memory_space<vmem>>) attributes {dimension_semantics = [#tpu.dimension_semantics<parallel>], iteration_bounds = array<i64: 2>, scalar_prefetch = 0 : i64, scratch_operands = 0 : i64, tpu.core_type = #tpu.core_type<tc>, window_params = [{transform_indices = @transform_0, window_bounds = array<i64: 1, 8, 128>}, {transform_indices = @transform_1, window_bounds = array<i64: 1, 8, 128>}, {transform_indices = @transform_2, window_bounds = array<i64: 1, 8, 128>}, {transform_indices = @transform_3, window_bounds = array<i64: 1, 8, 128>}, {pipeline_mode = #tpu.pipeline_mode<synchronous>, transform_indices = @transform_4, window_bounds = array<i64: 16, 72>}, {pipeline_mode = #tpu.pipeline_mode<synchronous>, transform_indices = @transform_5, window_bounds = array<i64: 16, 1>}, {transform_indices = @transform_6, window_bounds = array<i64: 1, 16, 63>}]} {
    %c0 = arith.constant 0 : index
    %c0_0 = arith.constant 0 : index
    %0 = vector.load %arg5[%c0, %c0_0] : memref<16x72xf32, #tpu.memory_space<vmem>>, vector<16x72xf32>
    %c0_1 = arith.constant 0 : index
    %c0_2 = arith.constant 0 : index
    %c0_3 = arith.constant 0 : index
    %1 = vector.load %arg4[%c0_1, %c0_2, %c0_3] : memref<1x8x128xf32, #tpu.memory_space<vmem>>, vector<1x8x63xf32>
    %2 = vector.shape_cast %1 : vector<1x8x63xf32> to vector<8x63xf32>
    %c0_4 = arith.constant 0 : index
    %c0_5 = arith.constant 0 : index
    %c1 = arith.constant 1 : index
    %3 = vector.load %arg3[%c0_4, %c0_5, %c1] : memref<1x8x128xf32, #tpu.memory_space<vmem>>, vector<1x8x63xf32>
    %4 = vector.shape_cast %3 : vector<1x8x63xf32> to vector<8x63xf32>
    %c0_6 = arith.constant 0 : index
    %c0_7 = arith.constant 0 : index
    %c1_8 = arith.constant 1 : index
    %5 = vector.load %arg4[%c0_6, %c0_7, %c1_8] : memref<1x8x128xf32, #tpu.memory_space<vmem>>, vector<1x8x63xf32>
    %6 = vector.shape_cast %5 : vector<1x8x63xf32> to vector<8x63xf32>
    %c0_9 = arith.constant 0 : index
    %c0_10 = arith.constant 0 : index
    %c9 = arith.constant 9 : index
    %7 = vector.load %arg2[%c0_9, %c0_10, %c9] : memref<1x8x128xf32, #tpu.memory_space<vmem>>, vector<1x8x63xf32>
    %8 = vector.shape_cast %7 : vector<1x8x63xf32> to vector<8x63xf32>
    %c0_11 = arith.constant 0 : index
    %c0_12 = arith.constant 0 : index
    %c10 = arith.constant 10 : index
    %9 = vector.load %arg1[%c0_11, %c0_12, %c10] : memref<1x8x128xf32, #tpu.memory_space<vmem>>, vector<1x8x63xf32>
    %10 = vector.shape_cast %9 : vector<1x8x63xf32> to vector<8x63xf32>
    %c0_13 = arith.constant 0 : index
    %c0_14 = arith.constant 0 : index
    %c10_15 = arith.constant 10 : index
    %11 = vector.load %arg2[%c0_13, %c0_14, %c10_15] : memref<1x8x128xf32, #tpu.memory_space<vmem>>, vector<1x8x63xf32>
    %12 = vector.shape_cast %11 : vector<1x8x63xf32> to vector<8x63xf32>
    %c0_16 = arith.constant 0 : index
    %c0_17 = arith.constant 0 : index
    %c9_18 = arith.constant 9 : index
    %13 = vector.load %arg4[%c0_16, %c0_17, %c9_18] : memref<1x8x128xf32, #tpu.memory_space<vmem>>, vector<1x8x63xf32>
    %14 = vector.shape_cast %13 : vector<1x8x63xf32> to vector<8x63xf32>
    %c0_19 = arith.constant 0 : index
    %c0_20 = arith.constant 0 : index
    %c10_21 = arith.constant 10 : index
    %15 = vector.load %arg3[%c0_19, %c0_20, %c10_21] : memref<1x8x128xf32, #tpu.memory_space<vmem>>, vector<1x8x63xf32>
    %16 = vector.shape_cast %15 : vector<1x8x63xf32> to vector<8x63xf32>
    %c0_22 = arith.constant 0 : index
    %c0_23 = arith.constant 0 : index
    %c10_24 = arith.constant 10 : index
    %17 = vector.load %arg4[%c0_22, %c0_23, %c10_24] : memref<1x8x128xf32, #tpu.memory_space<vmem>>, vector<1x8x63xf32>
    %18 = vector.shape_cast %17 : vector<1x8x63xf32> to vector<8x63xf32>
    %19 = tpu.concatenate %2, %4, %6, %8, %10, %12, %14, %16, %18 in 0 : vector<8x63xf32>, vector<8x63xf32>, vector<8x63xf32>, vector<8x63xf32>, vector<8x63xf32>, vector<8x63xf32>, vector<8x63xf32>, vector<8x63xf32>, vector<8x63xf32> -> vector<72x63xf32>
    %cst = arith.constant dense<0.000000e+00> : vector<16x63xf32>
    %20 = tpu.matmul %0, %19, %cst {dimension_numbers = #tpu.dot_dimension_numbers<[1], [0], [0], [1], [0, 0, 1, 1], [], []>} : vector<16x72xf32>, vector<72x63xf32>, vector<16x63xf32> -> vector<16x63xf32>
    %c0_25 = arith.constant 0 : index
    %c0_26 = arith.constant 0 : index
    %c1_27 = arith.constant 1 : index
    %21 = vector.load %arg3[%c0_25, %c0_26, %c1_27] : memref<1x8x128xf32, #tpu.memory_space<vmem>>, vector<1x8x63xf32>
    %22 = vector.shape_cast %21 : vector<1x8x63xf32> to vector<8x63xf32>
    %c0_28 = arith.constant 0 : index
    %c0_29 = arith.constant 0 : index
    %c1_30 = arith.constant 1 : index
    %23 = vector.load %arg4[%c0_28, %c0_29, %c1_30] : memref<1x8x128xf32, #tpu.memory_space<vmem>>, vector<1x8x63xf32>
    %24 = vector.shape_cast %23 : vector<1x8x63xf32> to vector<8x63xf32>
    %c0_31 = arith.constant 0 : index
    %c0_32 = arith.constant 0 : index
    %c2 = arith.constant 2 : index
    %25 = vector.load %arg3[%c0_31, %c0_32, %c2] : memref<1x8x128xf32, #tpu.memory_space<vmem>>, vector<1x8x63xf32>
    %26 = vector.shape_cast %25 : vector<1x8x63xf32> to vector<8x63xf32>
    %c0_33 = arith.constant 0 : index
    %c0_34 = arith.constant 0 : index
    %c10_35 = arith.constant 10 : index
    %27 = vector.load %arg1[%c0_33, %c0_34, %c10_35] : memref<1x8x128xf32, #tpu.memory_space<vmem>>, vector<1x8x63xf32>
    %28 = vector.shape_cast %27 : vector<1x8x63xf32> to vector<8x63xf32>
    %c0_36 = arith.constant 0 : index
    %c0_37 = arith.constant 0 : index
    %c10_38 = arith.constant 10 : index
    %29 = vector.load %arg2[%c0_36, %c0_37, %c10_38] : memref<1x8x128xf32, #tpu.memory_space<vmem>>, vector<1x8x63xf32>
    %30 = vector.shape_cast %29 : vector<1x8x63xf32> to vector<8x63xf32>
    %c0_39 = arith.constant 0 : index
    %c0_40 = arith.constant 0 : index
    %c11 = arith.constant 11 : index
    %31 = vector.load %arg1[%c0_39, %c0_40, %c11] : memref<1x8x128xf32, #tpu.memory_space<vmem>>, vector<1x8x63xf32>
    %32 = vector.shape_cast %31 : vector<1x8x63xf32> to vector<8x63xf32>
    %c0_41 = arith.constant 0 : index
    %c0_42 = arith.constant 0 : index
    %c10_43 = arith.constant 10 : index
    %33 = vector.load %arg3[%c0_41, %c0_42, %c10_43] : memref<1x8x128xf32, #tpu.memory_space<vmem>>, vector<1x8x63xf32>
    %34 = vector.shape_cast %33 : vector<1x8x63xf32> to vector<8x63xf32>
    %c0_44 = arith.constant 0 : index
    %c0_45 = arith.constant 0 : index
    %c10_46 = arith.constant 10 : index
    %35 = vector.load %arg4[%c0_44, %c0_45, %c10_46] : memref<1x8x128xf32, #tpu.memory_space<vmem>>, vector<1x8x63xf32>
    %36 = vector.shape_cast %35 : vector<1x8x63xf32> to vector<8x63xf32>
    %c0_47 = arith.constant 0 : index
    %c0_48 = arith.constant 0 : index
    %c11_49 = arith.constant 11 : index
    %37 = vector.load %arg3[%c0_47, %c0_48, %c11_49] : memref<1x8x128xf32, #tpu.memory_space<vmem>>, vector<1x8x63xf32>
    %38 = vector.shape_cast %37 : vector<1x8x63xf32> to vector<8x63xf32>
    %39 = tpu.concatenate %22, %24, %26, %28, %30, %32, %34, %36, %38 in 0 : vector<8x63xf32>, vector<8x63xf32>, vector<8x63xf32>, vector<8x63xf32>, vector<8x63xf32>, vector<8x63xf32>, vector<8x63xf32>, vector<8x63xf32>, vector<8x63xf32> -> vector<72x63xf32>
    %cst_50 = arith.constant dense<0.000000e+00> : vector<16x63xf32>
    %40 = tpu.matmul %0, %39, %cst_50 {dimension_numbers = #tpu.dot_dimension_numbers<[1], [0], [0], [1], [0, 0, 1, 1], [], []>} : vector<16x72xf32>, vector<72x63xf32>, vector<16x63xf32> -> vector<16x63xf32>
    %41 = arith.maximumf %20, %40 : vector<16x63xf32>
    %c0_51 = arith.constant 0 : index
    %c0_52 = arith.constant 0 : index
    %c9_53 = arith.constant 9 : index
    %42 = vector.load %arg2[%c0_51, %c0_52, %c9_53] : memref<1x8x128xf32, #tpu.memory_space<vmem>>, vector<1x8x63xf32>
    %43 = vector.shape_cast %42 : vector<1x8x63xf32> to vector<8x63xf32>
    %c0_54 = arith.constant 0 : index
    %c0_55 = arith.constant 0 : index
    %c10_56 = arith.constant 10 : index
    %44 = vector.load %arg1[%c0_54, %c0_55, %c10_56] : memref<1x8x128xf32, #tpu.memory_space<vmem>>, vector<1x8x63xf32>
    %45 = vector.shape_cast %44 : vector<1x8x63xf32> to vector<8x63xf32>
    %c0_57 = arith.constant 0 : index
    %c0_58 = arith.constant 0 : index
    %c10_59 = arith.constant 10 : index
    %46 = vector.load %arg2[%c0_57, %c0_58, %c10_59] : memref<1x8x128xf32, #tpu.memory_space<vmem>>, vector<1x8x63xf32>
    %47 = vector.shape_cast %46 : vector<1x8x63xf32> to vector<8x63xf32>
    %c0_60 = arith.constant 0 : index
    %c0_61 = arith.constant 0 : index
    %c9_62 = arith.constant 9 : index
    %48 = vector.load %arg4[%c0_60, %c0_61, %c9_62] : memref<1x8x128xf32, #tpu.memory_space<vmem>>, vector<1x8x63xf32>
    %49 = vector.shape_cast %48 : vector<1x8x63xf32> to vector<8x63xf32>
    %c0_63 = arith.constant 0 : index
    %c0_64 = arith.constant 0 : index
    %c10_65 = arith.constant 10 : index
    %50 = vector.load %arg3[%c0_63, %c0_64, %c10_65] : memref<1x8x128xf32, #tpu.memory_space<vmem>>, vector<1x8x63xf32>
    %51 = vector.shape_cast %50 : vector<1x8x63xf32> to vector<8x63xf32>
    %c0_66 = arith.constant 0 : index
    %c0_67 = arith.constant 0 : index
    %c10_68 = arith.constant 10 : index
    %52 = vector.load %arg4[%c0_66, %c0_67, %c10_68] : memref<1x8x128xf32, #tpu.memory_space<vmem>>, vector<1x8x63xf32>
    %53 = vector.shape_cast %52 : vector<1x8x63xf32> to vector<8x63xf32>
    %c0_69 = arith.constant 0 : index
    %c0_70 = arith.constant 0 : index
    %c18 = arith.constant 18 : index
    %54 = vector.load %arg2[%c0_69, %c0_70, %c18] : memref<1x8x128xf32, #tpu.memory_space<vmem>>, vector<1x8x63xf32>
    %55 = vector.shape_cast %54 : vector<1x8x63xf32> to vector<8x63xf32>
    %c0_71 = arith.constant 0 : index
    %c0_72 = arith.constant 0 : index
    %c19 = arith.constant 19 : index
    %56 = vector.load %arg1[%c0_71, %c0_72, %c19] : memref<1x8x128xf32, #tpu.memory_space<vmem>>, vector<1x8x63xf32>
    %57 = vector.shape_cast %56 : vector<1x8x63xf32> to vector<8x63xf32>
    %c0_73 = arith.constant 0 : index
    %c0_74 = arith.constant 0 : index
    %c19_75 = arith.constant 19 : index
    %58 = vector.load %arg2[%c0_73, %c0_74, %c19_75] : memref<1x8x128xf32, #tpu.memory_space<vmem>>, vector<1x8x63xf32>
    %59 = vector.shape_cast %58 : vector<1x8x63xf32> to vector<8x63xf32>
    %60 = tpu.concatenate %43, %45, %47, %49, %51, %53, %55, %57, %59 in 0 : vector<8x63xf32>, vector<8x63xf32>, vector<8x63xf32>, vector<8x63xf32>, vector<8x63xf32>, vector<8x63xf32>, vector<8x63xf32>, vector<8x63xf32>, vector<8x63xf32> -> vector<72x63xf32>
    %cst_76 = arith.constant dense<0.000000e+00> : vector<16x63xf32>
    %61 = tpu.matmul %0, %60, %cst_76 {dimension_numbers = #tpu.dot_dimension_numbers<[1], [0], [0], [1], [0, 0, 1, 1], [], []>} : vector<16x72xf32>, vector<72x63xf32>, vector<16x63xf32> -> vector<16x63xf32>
    %62 = arith.maximumf %41, %61 : vector<16x63xf32>
    %c0_77 = arith.constant 0 : index
    %c0_78 = arith.constant 0 : index
    %c10_79 = arith.constant 10 : index
    %63 = vector.load %arg1[%c0_77, %c0_78, %c10_79] : memref<1x8x128xf32, #tpu.memory_space<vmem>>, vector<1x8x63xf32>
    %64 = vector.shape_cast %63 : vector<1x8x63xf32> to vector<8x63xf32>
    %c0_80 = arith.constant 0 : index
    %c0_81 = arith.constant 0 : index
    %c10_82 = arith.constant 10 : index
    %65 = vector.load %arg2[%c0_80, %c0_81, %c10_82] : memref<1x8x128xf32, #tpu.memory_space<vmem>>, vector<1x8x63xf32>
    %66 = vector.shape_cast %65 : vector<1x8x63xf32> to vector<8x63xf32>
    %c0_83 = arith.constant 0 : index
    %c0_84 = arith.constant 0 : index
    %c11_85 = arith.constant 11 : index
    %67 = vector.load %arg1[%c0_83, %c0_84, %c11_85] : memref<1x8x128xf32, #tpu.memory_space<vmem>>, vector<1x8x63xf32>
    %68 = vector.shape_cast %67 : vector<1x8x63xf32> to vector<8x63xf32>
    %c0_86 = arith.constant 0 : index
    %c0_87 = arith.constant 0 : index
    %c10_88 = arith.constant 10 : index
    %69 = vector.load %arg3[%c0_86, %c0_87, %c10_88] : memref<1x8x128xf32, #tpu.memory_space<vmem>>, vector<1x8x63xf32>
    %70 = vector.shape_cast %69 : vector<1x8x63xf32> to vector<8x63xf32>
    %c0_89 = arith.constant 0 : index
    %c0_90 = arith.constant 0 : index
    %c10_91 = arith.constant 10 : index
    %71 = vector.load %arg4[%c0_89, %c0_90, %c10_91] : memref<1x8x128xf32, #tpu.memory_space<vmem>>, vector<1x8x63xf32>
    %72 = vector.shape_cast %71 : vector<1x8x63xf32> to vector<8x63xf32>
    %c0_92 = arith.constant 0 : index
    %c0_93 = arith.constant 0 : index
    %c11_94 = arith.constant 11 : index
    %73 = vector.load %arg3[%c0_92, %c0_93, %c11_94] : memref<1x8x128xf32, #tpu.memory_space<vmem>>, vector<1x8x63xf32>
    %74 = vector.shape_cast %73 : vector<1x8x63xf32> to vector<8x63xf32>
    %c0_95 = arith.constant 0 : index
    %c0_96 = arith.constant 0 : index
    %c19_97 = arith.constant 19 : index
    %75 = vector.load %arg1[%c0_95, %c0_96, %c19_97] : memref<1x8x128xf32, #tpu.memory_space<vmem>>, vector<1x8x63xf32>
    %76 = vector.shape_cast %75 : vector<1x8x63xf32> to vector<8x63xf32>
    %c0_98 = arith.constant 0 : index
    %c0_99 = arith.constant 0 : index
    %c19_100 = arith.constant 19 : index
    %77 = vector.load %arg2[%c0_98, %c0_99, %c19_100] : memref<1x8x128xf32, #tpu.memory_space<vmem>>, vector<1x8x63xf32>
    %78 = vector.shape_cast %77 : vector<1x8x63xf32> to vector<8x63xf32>
    %c0_101 = arith.constant 0 : index
    %c0_102 = arith.constant 0 : index
    %c20 = arith.constant 20 : index
    %79 = vector.load %arg1[%c0_101, %c0_102, %c20] : memref<1x8x128xf32, #tpu.memory_space<vmem>>, vector<1x8x63xf32>
    %80 = vector.shape_cast %79 : vector<1x8x63xf32> to vector<8x63xf32>
    %81 = tpu.concatenate %64, %66, %68, %70, %72, %74, %76, %78, %80 in 0 : vector<8x63xf32>, vector<8x63xf32>, vector<8x63xf32>, vector<8x63xf32>, vector<8x63xf32>, vector<8x63xf32>, vector<8x63xf32>, vector<8x63xf32>, vector<8x63xf32> -> vector<72x63xf32>
    %cst_103 = arith.constant dense<0.000000e+00> : vector<16x63xf32>
    %82 = tpu.matmul %0, %81, %cst_103 {dimension_numbers = #tpu.dot_dimension_numbers<[1], [0], [0], [1], [0, 0, 1, 1], [], []>} : vector<16x72xf32>, vector<72x63xf32>, vector<16x63xf32> -> vector<16x63xf32>
    %83 = arith.maximumf %62, %82 : vector<16x63xf32>
    %c0_104 = arith.constant 0 : index
    %c0_105 = arith.constant 0 : index
    %84 = vector.load %arg6[%c0_104, %c0_105] : memref<16x1xf32, #tpu.memory_space<vmem>>, vector<16x1xf32>
    %85 = vector.broadcast %84 : vector<16x1xf32> to vector<16x63xf32>
    %86 = arith.addf %83, %85 : vector<16x63xf32>
    %cst_106 = arith.constant 0.000000e+00 : f32
    %87 = vector.broadcast %cst_106 : f32 to vector<16x63xf32>
    %88 = arith.maximumf %86, %87 : vector<16x63xf32>
    %c0_107 = arith.constant 0 : index
    %c0_108 = arith.constant 0 : index
    %c0_109 = arith.constant 0 : index
    %89 = vector.load %arg7[%c0_107, %c0_108, %c0_109] : memref<1x16x63xf32, #tpu.memory_space<vmem>>, vector<1x16x63xf32>
    %90 = vector.shape_cast %89 : vector<1x16x63xf32> to vector<16x63xf32>
    %91 = vector.shape_cast %88 : vector<16x63xf32> to vector<1x16x63xf32>
    tpu.vector_store %arg7[%c0_107, %c0_108, %c0_109], %91 {strides = array<i32>} : memref<1x16x63xf32, #tpu.memory_space<vmem>>, vector<1x16x63xf32>,
    return
  }
  func.func @transform_0(%arg0: i32) -> (i32, i32, i32) {
    %c0_i32 = arith.constant 0 : i32
    %c0_i32_0 = arith.constant 0 : i32
    %c0_i32_1 = arith.constant 0 : i32
    return %arg0, %c0_i32, %c0_i32_0 : i32, i32, i32
  }
  func.func @transform_1(%arg0: i32) -> (i32, i32, i32) {
    %c0_i32 = arith.constant 0 : i32
    %c0_i32_0 = arith.constant 0 : i32
    %c0_i32_1 = arith.constant 0 : i32
    return %arg0, %c0_i32, %c0_i32_0 : i32, i32, i32
  }
  func.func @transform_2(%arg0: i32) -> (i32, i32, i32) {
    %c0_i32 = arith.constant 0 : i32
    %c0_i32_0 = arith.constant 0 : i32
    %c0_i32_1 = arith.constant 0 : i32
    return %arg0, %c0_i32, %c0_i32_0 : i32, i32, i32
  }
  func.func @transform_3(%arg0: i32) -> (i32, i32, i32) {
    %c0_i32 = arith.constant 0 : i32
    %c0_i32_0 = arith.constant 0 : i32
    %c0_i32_1 = arith.constant 0 : i32
    return %arg0, %c0_i32, %c0_i32_0 : i32, i32, i32
  }
  func.func @transform_4(%arg0: i32) -> (i32, i32) {
    %c0_i32 = arith.constant 0 : i32
    %c0_i32_0 = arith.constant 0 : i32
    %c0_i32_1 = arith.constant 0 : i32
    return %c0_i32, %c0_i32_0 : i32, i32
  }
  func.func @transform_5(%arg0: i32) -> (i32, i32) {
    %c0_i32 = arith.constant 0 : i32
    %c0_i32_0 = arith.constant 0 : i32
    %c0_i32_1 = arith.constant 0 : i32
    return %c0_i32, %c0_i32_0 : i32, i32
  }
  func.func @transform_6(%arg0: i32) -> (i32, i32, i32) {
    %c0_i32 = arith.constant 0 : i32
    %c0_i32_0 = arith.constant 0 : i32
    %c0_i32_1 = arith.constant 0 : i32
    return %arg0, %c0_i32, %c0_i32_0 : i32, i32, i32
  }
}

module attributes {stable_mosaic.version = 11 : i64} {
  func.func @_linear_kernel(%arg0: i32, %arg1: memref<2x784xf32, #tpu.memory_space<vmem>>, %arg2: memref<784x128xf32, #tpu.memory_space<vmem>>, %arg3: memref<1x128xf32, #tpu.memory_space<vmem>>, %arg4: memref<2x128xf32, #tpu.memory_space<vmem>>) attributes {dimension_semantics = [#tpu.dimension_semantics<parallel>], iteration_bounds = array<i64: 1>, scalar_prefetch = 0 : i64, scratch_operands = 0 : i64, tpu.core_type = #tpu.core_type<tc>, window_params = [{transform_indices = @transform_0, window_bounds = array<i64: 2, 784>}, {pipeline_mode = #tpu.pipeline_mode<synchronous>, transform_indices = @transform_1, window_bounds = array<i64: 784, 128>}, {pipeline_mode = #tpu.pipeline_mode<synchronous>, transform_indices = @transform_2, window_bounds = array<i64: 1, 128>}, {transform_indices = @transform_3, window_bounds = array<i64: 2, 128>}]} {
    %c0 = arith.constant 0 : index
    %c0_0 = arith.constant 0 : index
    %0 = vector.load %arg1[%c0, %c0_0] : memref<2x784xf32, #tpu.memory_space<vmem>>, vector<2x784xf32>
    %c0_1 = arith.constant 0 : index
    %c0_2 = arith.constant 0 : index
    %1 = vector.load %arg2[%c0_1, %c0_2] : memref<784x128xf32, #tpu.memory_space<vmem>>, vector<784x128xf32>
    %cst = arith.constant dense<0.000000e+00> : vector<2x128xf32>
    %2 = tpu.matmul %0, %1, %cst {dimension_numbers = #tpu.dot_dimension_numbers<[1], [0], [0], [1], [0, 0, 1, 1], [], []>} : vector<2x784xf32>, vector<784x128xf32>, vector<2x128xf32> -> vector<2x128xf32>
    %c0_3 = arith.constant 0 : index
    %c0_4 = arith.constant 0 : index
    %3 = vector.load %arg3[%c0_3, %c0_4] : memref<1x128xf32, #tpu.memory_space<vmem>>, vector<1x128xf32>
    %4 = vector.broadcast %3 : vector<1x128xf32> to vector<2x128xf32>
    %5 = arith.addf %2, %4 : vector<2x128xf32>
    %c0_5 = arith.constant 0 : index
    %c0_6 = arith.constant 0 : index
    %6 = vector.load %arg4[%c0_5, %c0_6] : memref<2x128xf32, #tpu.memory_space<vmem>>, vector<2x128xf32>
    tpu.vector_store %arg4[%c0_5, %c0_6], %5 {strides = array<i32>} : memref<2x128xf32, #tpu.memory_space<vmem>>, vector<2x128xf32>,
    return
  }
  func.func @transform_0(%arg0: i32) -> (i32, i32) {
    %c0_i32 = arith.constant 0 : i32
    %c0_i32_0 = arith.constant 0 : i32
    return %arg0, %c0_i32 : i32, i32
  }
  func.func @transform_1(%arg0: i32) -> (i32, i32) {
    %c0_i32 = arith.constant 0 : i32
    %c0_i32_0 = arith.constant 0 : i32
    %c0_i32_1 = arith.constant 0 : i32
    return %c0_i32, %c0_i32_0 : i32, i32
  }
  func.func @transform_2(%arg0: i32) -> (i32, i32) {
    %c0_i32 = arith.constant 0 : i32
    %c0_i32_0 = arith.constant 0 : i32
    %c0_i32_1 = arith.constant 0 : i32
    return %c0_i32, %c0_i32_0 : i32, i32
  }
  func.func @transform_3(%arg0: i32) -> (i32, i32) {
    %c0_i32 = arith.constant 0 : i32
    %c0_i32_0 = arith.constant 0 : i32
    return %arg0, %c0_i32 : i32, i32
  }
}

</mosaic_0001>

<bundles_post_ra>
// kernel: cnn_forward.3
= control target key start
LH: loop header
LB: loop body
LE: loop exit
PB: predicated region body
PF: predicated region fallthrough
CT: control target
= control target key end

     0   :  { %s1250_s21 = smov 0   ;;  %s1515_s0 = inlined_call_operand.vmem [shape: f32[2,1,384], index: 0, kind: input, shape index: {}]   ;;  %s1516_s1 = inlined_call_operand.vmem [shape: f32[2,1,384], index: 1, kind: input, shape index: {}]   ;;  %s1517_s2 = inlined_call_operand.vmem [shape: f32[2,1,384], index: 2, kind: input, shape index: {}]   ;;  %s1518_s3 = inlined_call_operand.vmem [shape: f32[2,1,384], index: 3, kind: input, shape index: {}]   ;;  %s1519_s4 = inlined_call_operand.vmem [shape: f32[8,9], index: 4, kind: input, shape index: {}]   ;;  %s1520_s5 = inlined_call_operand.vmem [shape: f32[8,1], index: 5, kind: input, shape index: {}]   ;;  %s1521_s6 = inlined_call_operand.vmem [shape: f32[2,8,224], index: 6, kind: output, shape index: {}]  }
   0x1 LB: > { %s1019_s22 = sadd.s32 4294967295, %s1207_s21   ;;  %p1023_p0 = scmp.ge.s32.totalorder %s1207_s21, 1  ;;  %s1207_s21 = sphi %s1250_s21, %s16_s21  }
   0x2   : > { %p238_p1 = scmp.lt.s32.totalorder %s1207_s21, 3 }
   0x4   : > { %p239_p2 = pnand %p1023_p0, %p238_p1 }
   0x5   : > { %p279_p3 = scmp.lt.s32.totalorder (!%p239_p2), %s1019_s22, 1  ;;  %v306_v0 = vlaneseq (!%p239_p2)  ;;  %s1209_s12 = smov (!%p239_p2), 127   ;;  %vm329_vm0 = vcmask (!%p239_p2), 1039360   ;;  %vm400_vm1 = vcmask (!%p239_p2), 1040384   ;;  %vm403_vm2 = vcmask (!%p239_p2), 1041408  }
   0x6   : > { %242 = sbr.rel (%p239_p2) target bundleno = 515 (0x203), region = 44  ;;  %s1210_s13 = smov (!%p239_p2), 112   ;;  %vm406_vm3 = vcmask (!%p239_p2), 1042432   ;;  %vm409_vm4 = vcmask (!%p239_p2), 1043456   ;;  %vm353_vm5 = vcmask (!%p239_p2), 916480   ;;  %vm370_vm6 = vcmask (!%p239_p2), 908288  }
   0x7   : > { %v307_v1 = vshrl.u32 (!%p239_p2), %v306_v0, 7  ;;  %s1211_s14 = smov (!%p239_p2), 111   ;;  %vm412_vm7 = vcmask (!%p239_p2), 1044480   ;;  %vm415_vm8 = vcmask (!%p239_p2), 1045504   ;;  %vm418_vm9 = vcmask (!%p239_p2), 1046528  }
   0x8   : > { %vm1214_vm10 = vmmov (!%p239_p2), 1   ;;  %vm421_vm12 = vcmask (!%p239_p2), 72704   ;;  %vm926_vm13 = vcmask (!%p239_p2), 785408  }
   0x9   : > { %v308_v2 = vsub.s32 (!%p239_p2), 0, %v307_v1  ;;  %v312_v3 = vsub.s32 (!%p239_p2), 1, %v307_v1  ;;  %v650_v19 = vsub.s32 (!%p239_p2), 2, %v307_v1  ;;  %vm1466_vm11 = vmpackc.low (!%p239_p2), %vm400_vm1, %vm1214_vm10 }
   0xd   : > { %s1525_s22 = smov (!%p279_p3, %s1019_s22), 1 }
   0xe   : > { %s1065_s23 = smul.u32 3, %s1525_s22  ;;  %s1040_s19 = sshll.u32 %s1525_s22, 4 }
   0xf   : > { %s299_s24 = scalar_lea.vmem %s1521_s6, %s1040_s19 }
  0x10   : > { %s290_s26 = scalar_lea.vmem %s1517_s2, %s1065_s23  ;;  %s282_s29 = scalar_lea.vmem %s1515_s0, %s1065_s23 }
  0x11   : > { %v302_v4 = vld [vmem:[%s290_s26] sm:$0x3]  ;;  %s286_s8 = scalar_lea.vmem %s1516_s1, %s1065_s23  ;;  %s294_s11 = scalar_lea.vmem %s1518_s3, %s1065_s23 }
  0x12   : > { %v304_v5 = vld [vmem:[%s282_s29] sm:$0x3]  ;;  %v1270_v6 = vrot.slane %v302_v4, %v308_v2  ;;  %v1272_v7 = vrot.slane %v302_v4, %v312_v3 }
  0x13   : > { %v1274_v8 = vrot.slane %v304_v5, %v308_v2  ;;  %v365_v9 = vrot.slane %v304_v5, %v312_v3  ;;  %v303_v10 = vld [vmem:[%s286_s8] sm:$0x3] }
  0x14   : > { %v1276_v11 = vrot.slane %v303_v10, %v308_v2  ;;  %v1278_v12 = vrot.slane %v303_v10, %v312_v3  ;;  %v1080_v13 = vpack.i.bf16 %v1272_v7, %v1270_v6  ;;  %v301_v16 = vld [vmem:[%s294_s11] sm:$0x3] }
  0x15   : > { %v1090_v14 = vpack.i.bf16 %v365_v9, %v1274_v8  ;;  %v1290_v17 = vrot.slane %v301_v16, %v308_v2  ;;  %v1294_v18 = vrot.slane %v301_v16, %v312_v3  ;;  %v621_v21 = vld [vmem:[%s282_s29] sm:$0x7] }
  0x16   : > { %1081 = vrot.lane.b32.xlu0 %v1080_v13, %s1209_s12  ;;  %v1095_v15 = vpack.i.bf16 %v1278_v12, %v1276_v11  ;;  %v622_v22 = vld [vmem:[%s286_s8] sm:$0x7]  ;;  %v651_v23 = vrot.slane %v621_v21, %v650_v19  ;;  %v643_v25 = vrot.slane %v621_v21, %v308_v2  ;;  %v647_v26 = vrot.slane %v621_v21, %v312_v3 }
  0x17   : > { %1091 = vrot.lane.b32.xlu1 %v1090_v14, %s1209_s12  ;;  %v1115_v20 = vpack.i.bf16 %v1294_v18, %v1290_v17  ;;  %v666_v24 = vrot.slane %v622_v22, %v308_v2  ;;  %v670_v27 = vrot.slane %v622_v22, %v312_v3  ;;  %v674_v30 = vrot.slane %v622_v22, %v650_v19 }
  0x18   : > { %v1130_v29 = vpack.i.bf16 %v647_v26, %v643_v25  ;;  %v516_v41 = vsel %vm400_vm1, %v1270_v6, %v1290_v17  ;;  %v811_v42 = vsel %vm400_vm1, %v365_v9, %v1278_v12  ;;  %v517_v43 = vsel %vm400_vm1, %v1272_v7, %v1294_v18 }
  0x19   : > { %v1135_v28 = vpack.i.bf16 %v666_v24, %v651_v23  ;;  %v1140_v31 = vpack.i.bf16 %v674_v30, %v670_v27  ;;  %v810_v53 = vsel %vm400_vm1, %v1274_v8, %v1276_v11 }
  0x1a   : > { %1086 = vrot.lane.b32.xlu0 %v1090_v14, %s1210_s13 }
  0x1b   : > { %1096 = vrot.lane.b32.xlu1 %v1095_v15, %s1210_s13 }
  0x1e   : > { %1101 = vrot.lane.b32.xlu0 %v1095_v15, %s1209_s12 }
  0x1f   : > { %1106 = vrot.lane.b32.xlu1 %v1090_v14, %s1211_s14 }
  0x22   : > { %1111 = vrot.lane.b32.xlu0 %v1080_v13, %s1210_s13 }
  0x23   : > { %1116 = vrot.lane.b32.xlu1 %v1115_v20, %s1209_s12 }
  0x26   : > { %1121 = vrot.lane.b32.xlu0 %v1115_v20, %s1210_s13 }
  0x27   : > { %1126 = vrot.lane.b32.xlu1 %v1080_v13, %s1211_s14 }
  0x2a   : > { %1131 = vrot.lane.b32.xlu0 %v1130_v29, %s1211_s14 }
  0x2b   : > { %1136 = vrot.lane.b32.xlu1 %v1135_v28, %s1211_s14 }
  0x2e   : > { %1141 = vrot.lane.b32.xlu0 %v1140_v31, %s1211_s14 }
  0x2f   : > { %1146 = vrot.lane.b32.xlu1 %v1130_v29, %s1210_s13 }
  0x32   : > { %1151 = vrot.lane.b32.xlu0 %v1135_v28, %s1210_s13 }
  0x33   : > { %1156 = vrot.lane.b32.xlu1 %v1140_v31, %s1210_s13 }
  0x36   : > { %1161 = vrot.lane.b32.xlu0 %v1095_v15, %s1211_s14 }
  0x37   : > { %1166 = vrot.lane.b32.xlu1 %v1115_v20, %s1211_s14 }
  0x88   : > { %v1082_v32 = vpop.permute.xlu0 %1081 }
  0x89   : > { %v1092_v33 = vpop.permute.xlu1 %1091  ;;  %v1312_v34 = vunpack.i.h.bf16 %v1082_v32  ;;  %v1083_v35 = vunpack.i.l.bf16 %v1082_v32 }
  0x8a   : > { %v1094_v36 = vunpack.i.h.bf16 %v1092_v33  ;;  %v1093_v37 = vunpack.i.l.bf16 %v1092_v33 }
  0x8b   : > { %v1316_v40 = vsel %vm329_vm0, %v1083_v35, %v1312_v34  ;;  %v519_v55 = vsel %vm403_vm2, %v517_v43, %v1312_v34 }
  0x8c   : > { %v1087_v39 = vpop.permute.xlu0 %1086  ;;  %v629_v48 = vsel %vm329_vm0, %v1093_v37, %v1094_v36  ;;  %v684_v51 = vsel %vm400_vm1, %v1278_v12, %v1094_v36  ;;  %v813_v52 = vsel %vm403_vm2, %v811_v42, %v1094_v36  ;;  %v518_v54 = vsel %vm403_vm2, %v516_v41, %v1316_v40 }
  0x8d   : > { %v1097_v38 = vpop.permute.xlu1 %1096  ;;  %v1089_v46 = vunpack.i.h.bf16 %v1087_v39  ;;  %v1088_v47 = vunpack.i.l.bf16 %v1087_v39  ;;  %v683_v58 = vsel %vm400_vm1, %v1276_v11, %v629_v48  ;;  %v815_v14 = vsel %vm406_vm3, %v813_v52, %v1272_v7 }
  0x8e   : > { %v1326_v44 = vunpack.i.h.bf16 %v1097_v38  ;;  %v1098_v45 = vunpack.i.l.bf16 %v1097_v38  ;;  %v812_v15 = vsel %vm403_vm2, %v810_v53, %v629_v48 }
  0x8f   : > { %v521_v60 = vsel %vm406_vm3, %v519_v55, %v1089_v46  ;;  %v506_v61 = vsel %vm353_vm5, %v1088_v47, %v1089_v46  ;;  %v814_v48 = vsel %vm406_vm3, %v812_v15, %v1270_v6  ;;  %v401_v6 = vsel %vm400_vm1, %v1290_v17, %v1316_v40 }
  0x90   : > { %v1102_v50 = vpop.permute.xlu0 %1101  ;;  %v1343_v59 = vsel %vm353_vm5, %v1098_v45, %v1326_v44  ;;  %v520_v10 = vsel %vm406_vm3, %v518_v54, %v506_v61  ;;  %v523_v16 = vsel %vm409_vm4, %v521_v60, %v1326_v44  ;;  %v1212_v61 = vmov 0.0  }
  0x91   : > { %v1107_v49 = vpop.permute.xlu1 %1106  ;;  %v1104_v56 = vunpack.i.h.bf16 %v1102_v50  ;;  %v1103_v57 = vunpack.i.l.bf16 %v1102_v50  ;;  %v522_v24 = vsel %vm409_vm4, %v520_v10, %v1343_v59  ;;  %493 = vmatprep.mubr.f32.mxu0 %v1212_v61  ;;  %612 = vmatprep.mubr.f32.mxu1 %v1212_v61 }
  0x92   : > { %v1347_v62 = vunpack.i.h.bf16 %v1107_v49  ;;  %v1108_v63 = vunpack.i.l.bf16 %v1107_v49 }
  0x93   : > { %v686_v0 = vsel %vm403_vm2, %v684_v51, %v1104_v56  ;;  %v636_v1 = vsel %vm329_vm0, %v1103_v57, %v1104_v56 }
  0x94   : > { %v1112_v3 = vpop.permute.xlu0 %1111  ;;  %v688_v4 = vsel %vm406_vm3, %v686_v0, %v1294_v18  ;;  %v685_v5 = vsel %vm403_vm2, %v683_v58, %v636_v1  ;;  %v1372_v7 = vsel %vm370_vm6, %v1108_v63, %v1347_v62  ;;  %v525_v27 = vsel %vm412_vm7, %v523_v16, %v1347_v62 }
  0x95   : > { %v1117_v2 = vpop.permute.xlu1 %1116  ;;  %v687_v11 = vsel %vm406_vm3, %v685_v5, %v1290_v17  ;;  %v1114_v12 = vunpack.i.h.bf16 %v1112_v3  ;;  %v1113_v13 = vunpack.i.l.bf16 %v1112_v3  ;;  %v690_v21 = vsel %vm409_vm4, %v688_v4, %v1312_v34 }
  0x96   : > { %v1354_v8 = vunpack.i.h.bf16 %v1117_v2  ;;  %v1118_v9 = vunpack.i.l.bf16 %v1117_v2  ;;  %v689_v20 = vsel %vm409_vm4, %v687_v11, %v1316_v40  ;;  %v524_v36 = vsel %vm412_vm7, %v522_v24, %v1372_v7 }
  0x97   : > { %v513_v28 = vsel %vm353_vm5, %v1113_v13, %v1114_v12  ;;  %v527_v33 = vsel %vm415_vm8, %v525_v27, %v1114_v12  ;;  %v817_v3 = vsel %vm409_vm4, %v815_v14, %v1294_v18  ;;  %v402_v4 = vsel %vm400_vm1, %v1294_v18, %v1312_v34 }
  0x98   : > { %v337_v19 = vsel %vm329_vm0, %v1118_v9, %v1354_v8  ;;  %v1122_v23 = vpop.permute.xlu0 %1121  ;;  %v692_v32 = vsel %vm412_vm7, %v690_v21, %v1354_v8  ;;  %v526_v47 = vsel %vm415_vm8, %v524_v36, %v513_v28  ;;  %v816_v9 = vsel %vm409_vm4, %v814_v48, %v1290_v17 }
  0x99   : > { %v1127_v22 = vpop.permute.xlu1 %1126  ;;  %v1381_v29 = vunpack.i.h.bf16 %v1122_v23  ;;  %v1123_v30 = vunpack.i.l.bf16 %v1122_v23  ;;  %v691_v31 = vsel %vm412_vm7, %v689_v20, %v337_v19  ;;  %v694_v51 = vsel %vm415_vm8, %v692_v32, %v1326_v44 }
  0x9a   : > { %v1376_v25 = vunpack.i.h.bf16 %v1127_v22  ;;  %v1128_v26 = vunpack.i.l.bf16 %v1127_v22  ;;  %v693_v50 = vsel %vm415_vm8, %v691_v31, %v1343_v59  ;;  %v405_v10 = vsel %vm403_vm2, %v402_v4, %v1354_v8 }
  0x9b   : > { %v1395_v37 = vsel %vm353_vm5, %v1123_v30, %v1381_v29  ;;  %v529_v42 = vsel %vm418_vm9, %v527_v33, %v1381_v29  ;;  %v404_v11 = vsel %vm403_vm2, %v401_v6, %v337_v19  ;;  %v408_v19 = vsel %vm406_vm3, %v405_v10, %v1326_v44 }
  0x9c   : > { %v1389_v35 = vsel %vm370_vm6, %v1128_v26, %v1376_v25  ;;  %v1132_v39 = vpop.permute.xlu0 %1131  ;;  %v528_v49 = vsel %vm418_vm9, %v526_v47, %v1395_v37  ;;  %v407_v8 = vsel %vm406_vm3, %v404_v11, %v1343_v59  ;;  %v818_v23 = vsel %vm412_vm7, %v816_v9, %v1316_v40 }
  0x9d   : > { %v1137_v38 = vpop.permute.xlu1 %1136  ;;  %v1170_v41 = vpack.i.bf16 %v1376_v25, %v1389_v35  ;;  %v1134_v45 = vunpack.i.h.bf16 %v1132_v39  ;;  %v1133_v46 = vunpack.i.l.bf16 %v1132_v39  ;;  %v1180_v54 = vpack.i.bf16 %v529_v42, %v528_v49 }
  0x9e   : > { %v1138_v43 = vunpack.i.l.bf16 %v1137_v38  ;;  %v1139_v55 = vunpack.i.h.bf16 %v1137_v38  ;;  %v819_v24 = vsel %vm412_vm7, %v817_v3, %v1312_v34  ;;  %v1213_v34 = vmov 0  }
  0x9f   : > { %1171 = vrot.lane.b32.xlu1 %v1170_v41, %s1209_s12  ;;  %v658_v53 = vsel %vm370_vm6, %v1133_v46, %v1134_v45  ;;  %1181 = vrot.lane.b32.xlu0 %v1180_v54, %s1209_s12  ;;  %v411_v41 = vsel %vm409_vm4, %v408_v19, %v1347_v62 }
  0xa0   : > { %v659_v52 = vsel %vm370_vm6, %v1134_v45, %v1138_v43  ;;  %v1142_v57 = vpop.permute.xlu0 %1141  ;;  %v695_v58 = vsel %vm418_vm9, %v693_v50, %v658_v53  ;;  %1200 = vset.pattern.permute.xlu0 %v1213_v34  ;;  %v410_v43 = vsel %vm409_vm4, %v407_v8, %v1372_v7 }
  0xa1   : > { %v1147_v56 = vpop.permute.xlu1 %1146  ;;  %v696_v60 = vsel %vm418_vm9, %v694_v51, %v659_v52  ;;  %v1144_v1 = vunpack.i.h.bf16 %v1142_v57  ;;  %v1143_v2 = vunpack.i.l.bf16 %v1142_v57  ;;  %v1195_v31 = vpack.i.bf16 %v659_v52, %v658_v53  ;;  %v915_v53 = vld [vmem:[%s1520_s5] sm:$0xff] }
  0xa2   : > { %v1149_v63 = vunpack.i.h.bf16 %v1147_v56  ;;  %v1148_v0 = vunpack.i.l.bf16 %v1147_v56  ;;  %v1185_v5 = vpack.i.bf16 %v696_v60, %v695_v58 }
  0xa3   : > { %v681_v12 = vsel %vm370_vm6, %v1139_v55, %v1143_v2  ;;  %v682_v13 = vsel %vm370_vm6, %v1143_v2, %v1144_v1 }
  0xa4   : > { %v796_v15 = vsel %vm353_vm5, %v1148_v0, %v1149_v63  ;;  %v1152_v16 = vpop.permute.xlu0 %1151  ;;  %v1175_v20 = vpack.i.bf16 %v682_v13, %v681_v12  ;;  %1186 = vrot.lane.b32.xlu0 %v1185_v5, %s1210_s13 }
  0xa5   : > { %v1157_v14 = vpop.permute.xlu1 %1156  ;;  %v1154_v22 = vunpack.i.h.bf16 %v1152_v16  ;;  %v1153_v17 = vunpack.i.l.bf16 %v1152_v16  ;;  %v820_v30 = vsel %vm415_vm8, %v818_v23, %v796_v15 }
  0xa6   : > { %v1159_v18 = vunpack.i.h.bf16 %v1157_v14  ;;  %v1158_v21 = vunpack.i.l.bf16 %v1157_v14  ;;  %1176 = vrot.lane.b32.xlu1 %v1175_v20, %s1210_s13 }
  0xa7   : > { %v797_v28 = vsel %vm353_vm5, %v1149_v63, %v1153_v17 }
  0xa8   : > { %v807_v26 = vsel %vm353_vm5, %v1158_v21, %v1159_v18  ;;  %v806_v27 = vsel %vm353_vm5, %v1154_v22, %v1158_v21  ;;  %v1162_v59 = vpop.permute.xlu0 %1161  ;;  %v821_v44 = vsel %vm415_vm8, %v819_v24, %v797_v28 }
  0xa9   : > { %v1167_v32 = vpop.permute.xlu1 %1166  ;;  %v822_v33 = vsel %vm418_vm9, %v820_v30, %v806_v27  ;;  %v1164_v36 = vunpack.i.h.bf16 %v1162_v59  ;;  %v1163_v40 = vunpack.i.l.bf16 %v1162_v59  ;;  %v823_v42 = vsel %vm418_vm9, %v821_v44, %v807_v26 }
  0xaa   : > { %v1169_v38 = vunpack.i.h.bf16 %v1167_v32  ;;  %v1168_v39 = vunpack.i.l.bf16 %v1167_v32  ;;  %1196 = vrot.lane.b32.xlu1 %v1195_v31, %s1211_s14  ;;  %v1190_v47 = vpack.i.bf16 %v823_v42, %v822_v33 }
  0xab   : > { %v414_v45 = vsel %vm412_vm7, %v411_v41, %v1164_v36  ;;  %v378_v46 = vsel %vm370_vm6, %v1163_v40, %v1164_v36 }
  0xac   : > { %v413_v48 = vsel %vm412_vm7, %v410_v43, %v378_v46  ;;  %v417_v49 = vsel %vm415_vm8, %v414_v45, %v1381_v29  ;;  %v399_v50 = vsel %vm370_vm6, %v1168_v39, %v1169_v38  ;;  %1191 = vrot.lane.b32.xlu0 %v1190_v47, %s1211_s14 }
  0xad   : > { %v420_v62 = vsel %vm418_vm9, %v417_v49, %v1376_v25  ;;  %v416_v51 = vsel %vm415_vm8, %v413_v48, %v1395_v37  ;;  %v300_v25 = vld [vmem:[%s1519_s4] sm:$0xff] }
  0xae   : > { %v1041_v52 = vpack.c.bf16 %v1169_v38, %v420_v62  ;;  %v419_v29 = vsel %vm418_vm9, %v416_v51, %v1389_v35 }
  0xaf   : > { %v1044_v54 = vpack.c.bf16 %v399_v50, %v419_v29 }
  0xb0   : > { %1043 = vmatprep.subr.msk.bf16.mxu0 %vm1466_vm11, %v1041_v52  ;;  %918 = vperm.xlu0 %1200, %v915_v53  }
  0xb1   : > { %1046 = vmatpush1.bf16.msk.msra.mxu0 %vm1466_vm11, %v1044_v54 }
  0xb4   : > { %1028 = vmatmul.mubr.msk.f32.vlgmr.msra.gmra.mrb[0].mxu0 %vm421_vm12, %v300_v25 }
  0xb5   : > { %779 = vmatprep.mubr.f32.mxu0 %v1212_v61 }
 0x111   : > { %v1172_v35 = vpop.permute.xlu1 %1171  ;;  %v1182_v55 = vpop.permute.xlu0 %1181 }
 0x112   : > { %v1174_v37 = vunpack.i.h.bf16 %v1172_v35  ;;  %v1173_v6 = vunpack.i.l.bf16 %v1172_v35  ;;  %v1184_v56 = vunpack.i.h.bf16 %v1182_v55  ;;  %v1183_v57 = vunpack.i.l.bf16 %v1182_v55 }
 0x114   : > { %v541_v58 = vsel %vm329_vm0, %v1173_v6, %v1174_v37  ;;  %v1047_v60 = vpack.c.bf16 %v1174_v37, %v1184_v56  ;;  %v540_v63 = vsel %vm329_vm0, %v1183_v57, %v1184_v56 }
 0x115   : > { %v1050_v1 = vpack.c.bf16 %v541_v58, %v540_v63 }
 0x116   : > { %v1187_v0 = vpop.permute.xlu0 %1186  ;;  %1049 = vmatprep.subr.msk.bf16.mxu1 %vm1466_vm11, %v1047_v60 }
 0x117   : > { %v1189_v2 = vunpack.i.h.bf16 %v1187_v0  ;;  %v1188_v3 = vunpack.i.l.bf16 %v1187_v0  ;;  %1052 = vmatpush1.bf16.msk.msra.mxu1 %vm1466_vm11, %v1050_v1 }
 0x118   : > { %v1177_v4 = vpop.permute.xlu1 %1176 }
 0x119   : > { %v1179_v5 = vunpack.i.h.bf16 %v1177_v4  ;;  %v1178_v9 = vunpack.i.l.bf16 %v1177_v4  ;;  %v707_v10 = vsel %vm353_vm5, %v1188_v3, %v1189_v2 }
 0x11a   : > { %1031 = vmatmul.mubr.msk.f32.vlgmr.msra.gmra.mrb[0].mxu1 %vm421_vm12, %v300_v25 }
 0x11b   : > { %v708_v11 = vsel %vm353_vm5, %v1178_v9, %v1179_v5  ;;  %v1053_v12 = vpack.c.bf16 %v1179_v5, %v1189_v2  ;;  %906 = vmatprep.mubr.f32.mxu1 %v1212_v61 }
 0x11c   : > { %v1056_v13 = vpack.c.bf16 %v708_v11, %v707_v10  ;;  %v1197_v15 = vpop.permute.xlu1 %1196 }
 0x11d   : > { %1055 = vmatprep.subr.msk.bf16.mxu0 %vm1466_vm11, %v1053_v12  ;;  %v1199_v14 = vunpack.i.h.bf16 %v1197_v15  ;;  %v1198_v16 = vunpack.i.l.bf16 %v1197_v15 }
 0x11e   : > { %1058 = vmatpush1.bf16.msk.msra.mxu0 %vm1466_vm11, %v1056_v13  ;;  %v1192_v20 = vpop.permute.xlu0 %1191 }
 0x11f   : > { %v1194_v18 = vunpack.i.h.bf16 %v1192_v20  ;;  %v1193_v21 = vunpack.i.l.bf16 %v1192_v20  ;;  %v835_v22 = vsel %vm370_vm6, %v1198_v16, %v1199_v14 }
 0x121   : > { %1034 = vmatmul.mubr.msk.f32.vlgmr.msra.gmra.mrb[2].mxu0 %vm421_vm12, %v300_v25  ;;  %v1059_v17 = vpack.c.bf16 %v1199_v14, %v1194_v18  ;;  %v834_v8 = vsel %vm370_vm6, %v1193_v21, %v1194_v18 }
 0x122   : > { %v1062_v19 = vpack.c.bf16 %v835_v22, %v834_v8 }
 0x123   : > { %1061 = vmatprep.subr.msk.bf16.mxu1 %vm1466_vm11, %v1059_v17 }
 0x124   : > { %1064 = vmatpush1.bf16.msk.msra.mxu1 %vm1466_vm11, %v1062_v19 }
 0x127   : > { %1037 = vmatmul.mubr.msk.f32.vlgmr.msra.gmra.mrb[2].mxu1 %vm421_vm12, %v300_v25 }
 0x12f   : > { %v919_v33 = vpop.permute.xlu0 %918 }
 0x187   : > { %v495_v61 = vpop.f32.mrb[0].mxu0 }
 0x188   : > { %v497_v23 = vpop.f32.mrb[1].mxu0 }
 0x1ed   : > { %v614_v24 = vpop.f32.mrb[0].mxu1 }
 0x1ee   : > { %v619_v26 = vmax.f32 %v495_v61, %v614_v24  ;;  %v616_v27 = vpop.f32.mrb[1].mxu1 }
 0x1ef   : > { %v620_v28 = vmax.f32 %v497_v23, %v616_v27 }
 0x1f4   : > { %v781_v30 = vpop.f32.mrb[2].mxu0 }
 0x1f5   : > { %v786_v59 = vmax.f32 %v619_v26, %v781_v30  ;;  %v783_v31 = vpop.f32.mrb[3].mxu0 }
 0x1f6   : > { %v787_v32 = vmax.f32 %v620_v28, %v783_v31 }
 0x1fa   : > { %v908_v44 = vpop.f32.mrb[2].mxu1 }
 0x1fb   : > { %v913_v36 = vmax.f32 %v786_v59, %v908_v44  ;;  %v910_v40 = vpop.f32.mrb[3].mxu1 }
 0x1fc   : > { %v914_v38 = vmax.f32 %v787_v32, %v910_v40 }
 0x1fd   : > { %v921_v39 = vadd.f32 %v919_v33, %v913_v36 }
 0x1fe   : > { %v922_v34 = vadd.f32 %v919_v33, %v914_v38 }
 0x1ff   : > { %v923_v41 = vmax.f32 %v921_v39, 0.0 }
 0x200   : > { %v924_v42 = vmax.f32 %v922_v34, 0.0 }
 0x201   : > { %925 = vst [vmem:[%s299_s24] sm:$0xff] %v923_v41 }
 0x202   : > { %927 = vst.msk [vmem:[%s299_s24 + $0x8] sm:$0xff] %vm926_vm13, %v924_v42 }
 0x203 PF: > { %s16_s21 = sadd.s32 1, %s1207_s21  }
 0x204   : > { %p13_p4 = scmp.ge.s32.totalorder %s16_s21, 4  }
 0x206   :  { %15 = sbr.rel (!%p13_p4) target bundleno = 1 (0x1), region = 83 }

// kernel: cnn_forward.4
= control target key start
LH: loop header
LB: loop body
LE: loop exit
PB: predicated region body
PF: predicated region fallthrough
CT: control target
= control target key end

     0   :  { %s1142_s21 = smov 0   ;;  %s1248_s0 = inlined_call_operand.vmem [shape: f32[2,8,128], index: 0, kind: input, shape index: {}]   ;;  %s1249_s1 = inlined_call_operand.vmem [shape: f32[2,8,128], index: 1, kind: input, shape index: {}]   ;;  %s1250_s2 = inlined_call_operand.vmem [shape: f32[2,8,128], index: 2, kind: input, shape index: {}]   ;;  %s1251_s3 = inlined_call_operand.vmem [shape: f32[2,8,128], index: 3, kind: input, shape index: {}]   ;;  %s1252_s4 = inlined_call_operand.vmem [shape: f32[16,72], index: 4, kind: input, shape index: {}]   ;;  %s1253_s5 = inlined_call_operand.vmem [shape: f32[16,1], index: 5, kind: input, shape index: {}]   ;;  %s1254_s6 = inlined_call_operand.vmem [shape: f32[2,16,63], index: 6, kind: output, shape index: {}]  }
   0x1 LB: > { %s822_s22 = sadd.s32 4294967295, %s1101_s21   ;;  %p826_p0 = scmp.ge.s32.totalorder %s1101_s21, 1  ;;  %s1101_s21 = sphi %s1142_s21, %s16_s21  }
   0x2   : > { %p238_p1 = scmp.lt.s32.totalorder %s1101_s21, 3 }
   0x4   : > { %p239_p2 = pnand %p826_p0, %p238_p1 }
   0x5   : > { %p279_p3 = scmp.lt.s32.totalorder (!%p239_p2), %s822_s22, 1  ;;  %s1103_s12 = smov (!%p239_p2), 127   ;;  %v1183_v14 = vld [vmem:[%s1252_s4] sm:$0xff] (!%p239_p2)  ;;  %vm334_vm0 = vcmask (!%p239_p2), 588800   ;;  %v713_v30 = vld [vmem:[%s1253_s5 + $0x8] sm:$0xff] (!%p239_p2)  ;;  %v1106_v31 = vmov (!%p239_p2), 0  }
   0x6   : > { %242 = sbr.rel (%p239_p2) target bundleno = 509 (0x1fd), region = 44  ;;  %s1104_s13 = smov (!%p239_p2), 119   ;;  %906 = vmatprep.mubr.msk.f32.mxu0 (!%p239_p2), %vm334_vm0, %v1183_v14  ;;  %927 = vmatprep.mubr.msk.f32.mxu1 (!%p239_p2), %vm334_vm0, %v1183_v14  ;;  %v712_v32 = vld [vmem:[%s1253_s5] sm:$0xff] (!%p239_p2)  ;;  %v1222_v41 = vld [vmem:[%s1252_s4 + $0x8] sm:$0xff] (!%p239_p2)  ;;  %vm728_vm1 = vcmask (!%p239_p2), 515072  }
   0x7   : > { %s1105_s14 = smov (!%p239_p2), 118   ;;  %1094 = vset.pattern.permute.xlu1 (!%p239_p2), %v1106_v31  ;;  %1093 = vset.pattern.permute.xlu0 (!%p239_p2), %v1106_v31 }
   0xd   : > { %s1256_s22 = smov (!%p279_p3, %s822_s22), 1 }
   0xe   : > { %s827_s23 = sshll.u32 %s1256_s22, 3  ;;  %s843_s25 = sshll.u32 %s1256_s22, 4 }
   0xf   : > { %s290_s26 = scalar_lea.vmem %s1250_s2, %s827_s23  ;;  %s286_s29 = scalar_lea.vmem %s1249_s1, %s827_s23 }
  0x10   : > { %v303_v0 = vld [vmem:[%s290_s26] sm:$0xff]  ;;  %s282_s8 = scalar_lea.vmem %s1248_s0, %s827_s23  ;;  %s294_s11 = scalar_lea.vmem %s1251_s3, %s827_s23 }
  0x11   : > { %v304_v1 = vld [vmem:[%s286_s29] sm:$0xff]  ;;  %307 = vrot.lane.b32.xlu0 %v303_v0, %s1103_s12  ;;  %s299_s28 = scalar_lea.vmem %s1254_s6, %s843_s25 }
  0x12   : > { %315 = vrot.lane.b32.xlu1 %v304_v1, %s1104_s13  ;;  %v305_v2 = vld [vmem:[%s282_s8] sm:$0xff] }
  0x13   : > { %v302_v3 = vld [vmem:[%s294_s11] sm:$0xff] }
  0x14   : > { %v1048_v4 = vpack.i.bf16 %v303_v0, %v302_v3 }
  0x15   : > { %416 = vrot.lane.b32.xlu0 %v305_v2, %s1104_s13 }
  0x16   : > { %319 = vrot.lane.b32.xlu1 %v305_v2, %s1105_s14 }
  0x19   : > { %1049 = vrot.lane.b32.xlu0 %v1048_v4, %s1104_s13 }
  0x1a   : > { %518 = vrot.lane.b32.xlu1 %v305_v2, %s1103_s12 }
  0x1d   : > { %328 = vrot.lane.b32.xlu0 %v303_v0, %s1105_s14 }
  0x1e   : > { %520 = vrot.lane.b32.xlu1 %v304_v1, %s1103_s12 }
  0x21   : > { %311 = vrot.lane.b32.xlu0 %v302_v3, %s1103_s12 }
  0x22   : > { %322 = vrot.lane.b32.xlu1 %v304_v1, %s1105_s14 }
  0x83   : > { %v308_v5 = vpop.permute.xlu0 %307 }
  0x84   : > { %v1175_v6 = vpop.permute.xlu1 %315  ;;  %v972_v7 = vpack.c.bf16 %v308_v5, %v302_v3 }
  0x86   : > { %973 = vmatprep.subr.bf16.mxu0 %v972_v7 }
  0x87   : > { %975 = vmatpush3.bf16.msra.mxu0 %v972_v7  ;;  %v417_v9 = vpop.permute.xlu0 %416 }
  0x88   : > { %v320_v8 = vpop.permute.xlu1 %319  ;;  %v1053_v10 = vpack.i.bf16 %v417_v9, %v308_v5  ;;  %v1088_v28 = vpack.i.bf16 %v1175_v6, %v417_v9 }
  0x89   : > { %v1058_v11 = vpack.i.bf16 %v320_v8, %v1175_v6 }
  0x8a   : > { %1054 = vrot.lane.b32.xlu0 %v1053_v10, %s1103_s12 }
  0x8b   : > { %1059 = vrot.lane.b32.xlu1 %v1058_v11, %s1103_s12  ;;  %v1050_v13 = vpop.permute.xlu0 %1049 }
  0x8c   : > { %v519_v12 = vpop.permute.xlu1 %518  ;;  %v1052_v15 = vunpack.i.h.bf16 %v1050_v13  ;;  %v1185_v16 = vunpack.i.l.bf16 %v1050_v13 }
  0x8d   : > { %v1073_v27 = vpack.i.bf16 %v308_v5, %v519_v12 }
  0x8e   : > { %v1063_v17 = vpack.i.bf16 %v1185_v16, %v1052_v15 }
  0x8f   : > { %331 = vrot.lane.b32.xlu1 %v302_v3, %s1105_s14  ;;  %v1193_v19 = vpop.permute.xlu0 %328 }
  0x90   : > { %v521_v18 = vpop.permute.xlu1 %520  ;;  %1064 = vrot.lane.b32.xlu0 %v1063_v17, %s1103_s12  ;;  %v984_v29 = vpack.c.bf16 %v1193_v19, %v1185_v16 }
  0x91   : > { %v1068_v20 = vpack.i.bf16 %v521_v18, %v519_v12 }
  0x93   : > { %432 = vrot.lane.b32.xlu1 %v1193_v19, %s1103_s12  ;;  %v312_v22 = vpop.permute.xlu0 %311 }
  0x94   : > { %v323_v21 = vpop.permute.xlu1 %322  ;;  %v976_v23 = vpack.c.bf16 %v1175_v6, %v312_v22  ;;  %v1078_v24 = vpack.i.bf16 %v312_v22, %v308_v5  ;;  %1069 = vrot.lane.b32.xlu0 %v1068_v20, %s1104_s13  ;;  %v988_v25 = vpack.c.bf16 %v312_v22, %v308_v5 }
  0x95   : > { %v1200_v26 = vpack.c.bf16 %v323_v21, %v320_v8 }
  0x96   : > { %977 = vmatprep.subr.bf16.mxu0 %v976_v23  ;;  %989 = vmatprep.subr.bf16.mxu1 %v988_v25 }
  0x97   : > { %1079 = vrot.lane.b32.xlu1 %v1078_v24, %s1104_s13  ;;  %979 = vmatpush3.bf16.msra.mxu0 %v976_v23 }
  0x98   : > { %991 = vmatpush3.bf16.msra.mxu1 %v988_v25  ;;  %981 = vmatprep.subr.bf16.mxu0 %v1200_v26 }
  0x99   : > { %1074 = vrot.lane.b32.xlu0 %v1073_v27, %s1105_s14 }
  0x9b   : > { %1089 = vrot.lane.b32.xlu1 %v1088_v28, %s1105_s14  ;;  %983 = vmatpush3.bf16.msra.mxu0 %v1200_v26 }
  0x9c   : > { %985 = vmatprep.subr.bf16.mxu0 %v984_v29 }
  0x9d   : > { %1084 = vrot.lane.b32.xlu0 %v1058_v11, %s1104_s13 }
  0x9f   : > { %628 = vrot.lane.b32.xlu1 %v320_v8, %s1105_s14  ;;  %987 = vmatpush3.bf16.msra.mxu0 %v984_v29 }
  0xa1   : > { %534 = vrot.lane.b32.xlu0 %v323_v21, %s1104_s13 }
  0xa3   : > { %721 = vperm.xlu1 %1094, %v713_v30  }
  0xa5   : > { %716 = vperm.xlu0 %1093, %v712_v32  }
  0xfc   : > { %v1055_v34 = vpop.permute.xlu0 %1054 }
  0xfd   : > { %v1060_v33 = vpop.permute.xlu1 %1059  ;;  %v1057_v37 = vunpack.i.h.bf16 %v1055_v34  ;;  %v1056_v38 = vunpack.i.l.bf16 %v1055_v34 }
  0xfe   : > { %v1062_v35 = vunpack.i.h.bf16 %v1060_v33  ;;  %v1061_v36 = vunpack.i.l.bf16 %v1060_v33 }
  0xff   : > { %v992_v39 = vpack.c.bf16 %v1057_v37, %v1056_v38 }
 0x100   : > { %v996_v42 = vpack.c.bf16 %v1062_v35, %v1061_v36 }
 0x101   : > { %v332_v40 = vpop.permute.xlu1 %331  ;;  %993 = vmatprep.subr.bf16.mxu1 %v992_v39 }
 0x102   : > { %904 = vmatprep.subr.mxu0 %v332_v40  ;;  %995 = vmatpush3.bf16.msra.mxu1 %v992_v39  ;;  %v1065_v43 = vpop.permute.xlu0 %1064 }
 0x103   : > { %905 = vmatpush3.msra.mxu0 %v332_v40  ;;  %v1067_v44 = vunpack.i.h.bf16 %v1065_v43  ;;  %v1066_v45 = vunpack.i.l.bf16 %v1065_v43  ;;  %997 = vmatprep.subr.bf16.mxu1 %v996_v42 }
 0x104   : > { %907 = vmatmul.mubr.msk.f32.vlgmr.msra.gmra.mrb[0].mxu0 %vm334_vm0, %v1222_v41 }
 0x105   : > { %v433_v46 = vpop.permute.xlu1 %432  ;;  %948 = vmatprep.mubr.msk.f32.mxu0 %vm334_vm0, %v1183_v14  ;;  %v1000_v47 = vpack.c.bf16 %v1067_v44, %v1066_v45 }
 0x106   : > { %999 = vmatpush3.bf16.msra.mxu1 %v996_v42  ;;  %v1070_v48 = vpop.permute.xlu0 %1069 }
 0x107   : > { %v1072_v49 = vunpack.i.h.bf16 %v1070_v48  ;;  %v1071_v50 = vunpack.i.l.bf16 %v1070_v48  ;;  %1001 = vmatprep.subr.bf16.mxu1 %v1000_v47 }
 0x109   : > { %v1004_v51 = vpack.c.bf16 %v1071_v50, %v1175_v6  ;;  %v1080_v52 = vpop.permute.xlu1 %1079  ;;  %v1008_v53 = vpack.c.bf16 %v1185_v16, %v1072_v49 }
 0x10a   : > { %1003 = vmatpush3.bf16.msra.mxu1 %v1000_v47  ;;  %v1082_v54 = vunpack.i.h.bf16 %v1080_v52  ;;  %v1081_v55 = vunpack.i.l.bf16 %v1080_v52 }
 0x10b   : > { %v1075_v56 = vpop.permute.xlu0 %1074  ;;  %925 = vmatprep.subr.mxu1 %v433_v46  ;;  %1005 = vmatprep.subr.bf16.mxu0 %v1004_v51 }
 0x10c   : > { %v1076_v57 = vunpack.i.l.bf16 %v1075_v56  ;;  %1007 = vmatpush3.bf16.msra.mxu0 %v1004_v51  ;;  %v1012_v58 = vpack.c.bf16 %v1082_v54, %v1081_v55  ;;  %v1077_v59 = vunpack.i.h.bf16 %v1075_v56 }
 0x10d   : > { %1009 = vmatprep.subr.bf16.mxu0 %v1008_v53  ;;  %v1090_v62 = vpop.permute.xlu1 %1089 }
 0x10e   : > { %926 = vmatpush3.msra.mxu1 %v433_v46  ;;  %v1024_v60 = vpack.c.bf16 %v1193_v19, %v1076_v57  ;;  %v1028_v1 = vpack.c.bf16 %v1077_v59, %v332_v40  ;;  %v1092_v2 = vunpack.i.h.bf16 %v1090_v62  ;;  %v1091_v3 = vunpack.i.l.bf16 %v1090_v62 }
 0x10f   : > { %v1085_v61 = vpop.permute.xlu0 %1084  ;;  %928 = vmatmul.mubr.msk.f32.vlgmr.msra.gmra.mrb[0].mxu1 %vm334_vm0, %v1222_v41  ;;  %1021 = vmatprep.subr.bf16.mxu1 %v1200_v26 }
 0x110   : > { %v1087_v63 = vunpack.i.h.bf16 %v1085_v61  ;;  %v1086_v0 = vunpack.i.l.bf16 %v1085_v61  ;;  %1011 = vmatpush3.bf16.msra.mxu0 %v1008_v53  ;;  %1023 = vmatpush3.bf16.msra.mxu1 %v1200_v26  ;;  %v1032_v6 = vpack.c.bf16 %v1092_v2, %v1091_v3 }
 0x111   : > { %1013 = vmatprep.subr.bf16.mxu0 %v1012_v58  ;;  %1025 = vmatprep.subr.bf16.mxu1 %v1024_v60  ;;  %v629_v7 = vpop.permute.xlu1 %628 }
 0x112   : > { %969 = vmatprep.mubr.msk.f32.mxu1 %vm334_vm0, %v1183_v14  ;;  %v1016_v4 = vpack.c.bf16 %v1087_v63, %v1086_v0 }
 0x113   : > { %v535_v5 = vpop.permute.xlu0 %534 }
 0x114   : > { %1015 = vmatpush3.bf16.msra.mxu0 %v1012_v58  ;;  %1027 = vmatpush3.bf16.msra.mxu1 %v1024_v60 }
 0x115   : > { %1017 = vmatprep.subr.bf16.mxu0 %v1016_v4  ;;  %1029 = vmatprep.subr.bf16.mxu1 %v1028_v1 }
 0x118   : > { %1019 = vmatpush3.bf16.msra.mxu0 %v1016_v4  ;;  %1031 = vmatpush3.bf16.msra.mxu1 %v1028_v1 }
 0x119   : > { %1033 = vmatprep.subr.bf16.mxu1 %v1032_v6  ;;  %946 = vmatprep.subr.mxu0 %v535_v5 }
 0x11c   : > { %947 = vmatpush3.msra.mxu0 %v535_v5  ;;  %1035 = vmatpush3.bf16.msra.mxu1 %v1032_v6 }
 0x11d   : > { %949 = vmatmul.mubr.msk.f32.vlgmr.msra.gmra.mrb[2].mxu0 %vm334_vm0, %v1222_v41  ;;  %967 = vmatprep.subr.mxu1 %v629_v7 }
 0x120   : > { %968 = vmatpush3.msra.mxu1 %v629_v7 }
 0x121   : > { %970 = vmatmul.mubr.msk.f32.vlgmr.msra.gmra.mrb[2].mxu1 %vm334_vm0, %v1222_v41 }
 0x122   : > { %v722_v19 = vpop.permute.xlu1 %721 }
 0x124   : > { %v717_v22 = vpop.permute.xlu0 %716 }
 0x1d7   : > { %v908_v8 = vpop.f32.mrb[0].mxu0 }
 0x1d8   : > { %v407_v9 = vpop.f32.mrb[1].mxu0 }
 0x1e2   : > { %v929_v10 = vpop.f32.mrb[0].mxu1 }
 0x1e3   : > { %v517_v11 = vmax.f32 %v908_v8, %v929_v10  ;;  %v507_v12 = vpop.f32.mrb[1].mxu1 }
 0x1e4   : > { %v516_v13 = vmax.f32 %v407_v9, %v507_v12 }
 0x1f0   : > { %v950_v14 = vpop.f32.mrb[2].mxu0 }
 0x1f1   : > { %v619_v15 = vmax.f32 %v517_v11, %v950_v14  ;;  %v609_v16 = vpop.f32.mrb[3].mxu0 }
 0x1f2   : > { %v618_v17 = vmax.f32 %v516_v13, %v609_v16 }
 0x1f4   : > { %v971_v18 = vpop.f32.mrb[2].mxu1 }
 0x1f5   : > { %v711_v20 = vmax.f32 %v619_v15, %v971_v18  ;;  %v701_v21 = vpop.f32.mrb[3].mxu1 }
 0x1f6   : > { %v710_v23 = vmax.f32 %v618_v17, %v701_v21 }
 0x1f7   : > { %v725_v24 = vadd.f32 %v722_v19, %v711_v20 }
 0x1f8   : > { %v724_v25 = vadd.f32 %v717_v22, %v710_v23 }
 0x1f9   : > { %v727_v26 = vmax.f32 %v725_v24, 0.0 }
 0x1fa   : > { %v726_v27 = vmax.f32 %v724_v25, 0.0 }
 0x1fb   : > { %730 = vst.msk [vmem:[%s299_s28 + $0x8] sm:$0xff] %vm728_vm1, %v727_v26 }
 0x1fc   : > { %729 = vst.msk [vmem:[%s299_s28] sm:$0xff] %vm728_vm1, %v726_v27 }
 0x1fd PF: > { %s16_s21 = sadd.s32 1, %s1101_s21  }
 0x1fe   : > { %p13_p4 = scmp.ge.s32.totalorder %s16_s21, 4  }
 0x200   :  { %15 = sbr.rel (!%p13_p4) target bundleno = 1 (0x1), region = 83 }

// kernel: cnn_forward.5
= control target key start
LH: loop header
LB: loop body
LE: loop exit
PB: predicated region body
PF: predicated region fallthrough
CT: control target
= control target key end

     0   :  { %v708_v43 = vmov 1983009808   ;;  %v128_v45 = vlaneseq  ;;  %s1059_s0 = inlined_call_operand.vmem [shape: f32[2,784], index: 0, kind: input, shape index: {}]   ;;  %s1060_s1 = inlined_call_operand.vmem [shape: f32[784,128], index: 1, kind: input, shape index: {}]   ;;  %s1061_s2 = inlined_call_operand.vmem [shape: f32[1,128], index: 2, kind: input, shape index: {}]   ;;  %s1062_s3 = inlined_call_operand.hbm [shape: f32[2,128], index: 3, kind: output, shape index: {}]  }
   0x1   :  { %v33_v0 = vld [vmem:[%s1060_s1 + $0x80] sm:$0xff]  ;;  %v34_v1 = vld [vmem:[%s1060_s1 + $0x88] sm:$0xff]  ;;  %v35_v11 = vld [vmem:[%s1060_s1 + $0x90] sm:$0xff]  ;;  %v126_v44 = vunpack.c.l.s4 %v708_v43 }
   0x2   :  { %v17_v2 = vld [vmem:[%s1060_s1] sm:$0xff]  ;;  %v578_v3 = vpack.c.bf16 %v34_v1, %v33_v0  ;;  %v18_v4 = vld [vmem:[%s1060_s1 + $0x8] sm:$0xff]  ;;  %v36_v13 = vld [vmem:[%s1060_s1 + $0x98] sm:$0xff]  ;;  %v129_v60 = vshrl.u32 %v128_v45, 7 }
   0x3   :  { %v65_v5 = vld [vmem:[%s1060_s1 + $0x180] sm:$0xff]  ;;  %v66_v6 = vld [vmem:[%s1060_s1 + $0x188] sm:$0xff]  ;;  %v580_v7 = vpack.c.bf16 %v18_v4, %v17_v2  ;;  %v19_v14 = vld [vmem:[%s1060_s1 + $0x10] sm:$0xff]  ;;  %v582_v16 = vpack.c.bf16 %v36_v13, %v35_v11  ;;  %v127_v59 = vunpack.c.0.s8 %v126_v44 }
   0x4   :  { %v610_v8 = vpack.c.bf16 %v66_v6, %v65_v5  ;;  %v49_v9 = vld [vmem:[%s1060_s1 + $0x100] sm:$0xff]  ;;  %v50_v10 = vld [vmem:[%s1060_s1 + $0x108] sm:$0xff]  ;;  %579 = vmatprep.subr.bf16.mxu0 %v578_v3  ;;  %v20_v15 = vld [vmem:[%s1060_s1 + $0x18] sm:$0xff] }
   0x5   :  { %v612_v12 = vpack.c.bf16 %v50_v10, %v49_v9  ;;  %581 = vmatpush3.bf16.msra.mxu0 %v580_v7  ;;  %v584_v17 = vpack.c.bf16 %v20_v15, %v19_v14  ;;  %v67_v18 = vld [vmem:[%s1060_s1 + $0x190] sm:$0xff]  ;;  %v68_v19 = vld [vmem:[%s1060_s1 + $0x198] sm:$0xff]  ;;  %v37_v23 = vld [vmem:[%s1060_s1 + $0xa0] sm:$0xff]  ;;  %v877_v10 = vsub.s32 %v127_v59, %v129_v60 }
   0x6   :  { %611 = vmatprep.subr.bf16.mxu1 %v610_v8  ;;  %v51_v20 = vld [vmem:[%s1060_s1 + $0x110] sm:$0xff]  ;;  %v614_v21 = vpack.c.bf16 %v68_v19, %v67_v18  ;;  %v52_v22 = vld [vmem:[%s1060_s1 + $0x118] sm:$0xff]  ;;  %v38_v24 = vld [vmem:[%s1060_s1 + $0xa8] sm:$0xff]  ;;  %583 = vmatprep.subr.bf16.mxu0 %v582_v16 }
   0x7   :  { %613 = vmatpush3.bf16.msra.mxu1 %v612_v12  ;;  %v616_v25 = vpack.c.bf16 %v52_v22, %v51_v20  ;;  %v586_v26 = vpack.c.bf16 %v38_v24, %v37_v23  ;;  %v21_v27 = vld [vmem:[%s1060_s1 + $0x20] sm:$0xff]  ;;  %v22_v28 = vld [vmem:[%s1060_s1 + $0x28] sm:$0xff]  ;;  %v39_v35 = vld [vmem:[%s1060_s1 + $0xb0] sm:$0xff] }
   0x8   :  { %v69_v29 = vld [vmem:[%s1060_s1 + $0x1a0] sm:$0xff]  ;;  %615 = vmatprep.subr.bf16.mxu1 %v614_v21  ;;  %v70_v30 = vld [vmem:[%s1060_s1 + $0x1a8] sm:$0xff]  ;;  %v588_v33 = vpack.c.bf16 %v22_v28, %v21_v27  ;;  %v40_v36 = vld [vmem:[%s1060_s1 + $0xb8] sm:$0xff] }
   0x9   :  { %v53_v31 = vld [vmem:[%s1060_s1 + $0x120] sm:$0xff]  ;;  %v54_v32 = vld [vmem:[%s1060_s1 + $0x128] sm:$0xff]  ;;  %585 = vmatpush3.bf16.msra.mxu0 %v584_v17  ;;  %v618_v34 = vpack.c.bf16 %v70_v30, %v69_v29  ;;  %v23_v37 = vld [vmem:[%s1060_s1 + $0x30] sm:$0xff]  ;;  %v590_v39 = vpack.c.bf16 %v40_v36, %v39_v35 }
   0xa   :  { %587 = vmatprep.subr.bf16.mxu0 %v586_v26  ;;  %v620_v38 = vpack.c.bf16 %v54_v32, %v53_v31  ;;  %v24_v40 = vld [vmem:[%s1060_s1 + $0x38] sm:$0xff]  ;;  %v71_v41 = vld [vmem:[%s1060_s1 + $0x1b0] sm:$0xff]  ;;  %v41_v49 = vld [vmem:[%s1060_s1 + $0xc0] sm:$0xff] }
   0xb   :  { %617 = vmatpush3.bf16.msra.mxu1 %v616_v25  ;;  %v72_v42 = vld [vmem:[%s1060_s1 + $0x1b8] sm:$0xff]  ;;  %v55_v47 = vld [vmem:[%s1060_s1 + $0x130] sm:$0xff]  ;;  %v42_v50 = vld [vmem:[%s1060_s1 + $0xc8] sm:$0xff]  ;;  %v592_v51 = vpack.c.bf16 %v24_v40, %v23_v37 }
   0xc   :  { %619 = vmatprep.subr.bf16.mxu1 %v618_v34  ;;  %v622_v46 = vpack.c.bf16 %v72_v42, %v71_v41  ;;  %v56_v48 = vld [vmem:[%s1060_s1 + $0x138] sm:$0xff]  ;;  %v73_v52 = vld [vmem:[%s1060_s1 + $0x1c0] sm:$0xff]  ;;  %v74_v53 = vld [vmem:[%s1060_s1 + $0x1c8] sm:$0xff]  ;;  %v594_v55 = vpack.c.bf16 %v42_v50, %v41_v49 }
   0xd   :  { %589 = vmatpush3.bf16.msra.mxu0 %v588_v33  ;;  %v624_v54 = vpack.c.bf16 %v56_v48, %v55_v47  ;;  %v25_v56 = vld [vmem:[%s1060_s1 + $0x40] sm:$0xff]  ;;  %v26_v57 = vld [vmem:[%s1060_s1 + $0x48] sm:$0xff]  ;;  %v626_v61 = vpack.c.bf16 %v74_v53, %v73_v52  ;;  %v43_v63 = vld [vmem:[%s1060_s1 + $0xd0] sm:$0xff] }
   0xe   :  { %591 = vmatprep.subr.bf16.mxu0 %v590_v39  ;;  %v57_v58 = vld [vmem:[%s1060_s1 + $0x140] sm:$0xff]  ;;  %v58_v62 = vld [vmem:[%s1060_s1 + $0x148] sm:$0xff]  ;;  %v44_v0 = vld [vmem:[%s1060_s1 + $0xd8] sm:$0xff]  ;;  %v596_v3 = vpack.c.bf16 %v26_v57, %v25_v56 }
   0xf   :  { %621 = vmatpush3.bf16.msra.mxu1 %v620_v38  ;;  %v75_v1 = vld [vmem:[%s1060_s1 + $0x1d0] sm:$0xff]  ;;  %v76_v2 = vld [vmem:[%s1060_s1 + $0x1d8] sm:$0xff]  ;;  %v628_v5 = vpack.c.bf16 %v58_v62, %v57_v58  ;;  %v598_v6 = vpack.c.bf16 %v44_v0, %v43_v63  ;;  %v45_v12 = vld [vmem:[%s1060_s1 + $0xe0] sm:$0xff] }
  0x10   :  { %623 = vmatprep.subr.bf16.mxu1 %v622_v46  ;;  %v27_v4 = vld [vmem:[%s1060_s1 + $0x50] sm:$0xff]  ;;  %v28_v7 = vld [vmem:[%s1060_s1 + $0x58] sm:$0xff]  ;;  %v630_v11 = vpack.c.bf16 %v76_v2, %v75_v1  ;;  %v46_v13 = vld [vmem:[%s1060_s1 + $0xe8] sm:$0xff] }
  0x11   :  { %593 = vmatpush3.bf16.msra.mxu0 %v592_v51  ;;  %v59_v8 = vld [vmem:[%s1060_s1 + $0x150] sm:$0xff]  ;;  %v60_v9 = vld [vmem:[%s1060_s1 + $0x158] sm:$0xff]  ;;  %v77_v14 = vld [vmem:[%s1060_s1 + $0x1e0] sm:$0xff]  ;;  %v600_v16 = vpack.c.bf16 %v28_v7, %v27_v4  ;;  %v602_v19 = vpack.c.bf16 %v46_v13, %v45_v12 }
  0x12   :  { %595 = vmatprep.subr.bf16.mxu0 %v594_v55  ;;  %v78_v15 = vld [vmem:[%s1060_s1 + $0x1e8] sm:$0xff]  ;;  %v632_v17 = vpack.c.bf16 %v60_v9, %v59_v8  ;;  %v15_v18 = vld [vmem:[%s1059_s0] sm:$0xff]  ;;  %v47_v27 = vld [vmem:[%s1060_s1 + $0xf0] sm:$0xff] }
  0x13   :  { %625 = vmatpush3.bf16.msra.mxu1 %v624_v54  ;;  %v29_v20 = vld [vmem:[%s1060_s1 + $0x60] sm:$0xff]  ;;  %v30_v21 = vld [vmem:[%s1060_s1 + $0x68] sm:$0xff]  ;;  %v131_v23 = vrot.slane %v15_v18, %v877_v10  ;;  %v124_v24 = vcombine.high %v15_v18, %v15_v18  ;;  %v634_v25 = vpack.c.bf16 %v78_v15, %v77_v14  ;;  %v48_v28 = vld [vmem:[%s1060_s1 + $0xf8] sm:$0xff] }
  0x14   :  { %627 = vmatprep.subr.bf16.mxu1 %v626_v61  ;;  %v61_v22 = vld [vmem:[%s1060_s1 + $0x160] sm:$0xff]  ;;  %v62_v26 = vld [vmem:[%s1060_s1 + $0x168] sm:$0xff]  ;;  %v79_v29 = vld [vmem:[%s1060_s1 + $0x1f0] sm:$0xff]  ;;  %v604_v33 = vpack.c.bf16 %v30_v21, %v29_v20  ;;  %v606_v35 = vpack.c.bf16 %v48_v28, %v47_v27 }
  0x15   :  { %597 = vmatpush3.bf16.msra.mxu0 %v596_v3  ;;  %v80_v30 = vld [vmem:[%s1060_s1 + $0x1f8] sm:$0xff]  ;;  %v139_v31 = vcombine.high %v131_v23, %v131_v23  ;;  %v138_v32 = vrot.slane %v124_v24, %v877_v10  ;;  %v636_v34 = vpack.c.bf16 %v62_v26, %v61_v22  ;;  %v31_v36 = vld [vmem:[%s1060_s1 + $0x70] sm:$0xff]  ;;  %v97_v42 = vld [vmem:[%s1060_s1 + $0x280] sm:$0xff] }
  0x16   :  { %599 = vmatprep.subr.bf16.mxu0 %v598_v6  ;;  %v32_v37 = vld [vmem:[%s1060_s1 + $0x78] sm:$0xff]  ;;  %v63_v38 = vld [vmem:[%s1060_s1 + $0x170] sm:$0xff]  ;;  %v638_v40 = vpack.c.bf16 %v80_v30, %v79_v29  ;;  %v98_v43 = vld [vmem:[%s1060_s1 + $0x288] sm:$0xff] }
  0x17   :  { %629 = vmatpush3.bf16.msra.mxu1 %v628_v5  ;;  %v140_v39 = vcombine.high %v138_v32, %v138_v32  ;;  %230 = vmatprep.mubr.f32.mxu0 %v139_v31  ;;  %v64_v41 = vld [vmem:[%s1060_s1 + $0x178] sm:$0xff]  ;;  %v608_v44 = vpack.c.bf16 %v32_v37, %v31_v36  ;;  %v642_v46 = vpack.c.bf16 %v98_v43, %v97_v42  ;;  %v81_v47 = vld [vmem:[%s1060_s1 + $0x200] sm:$0xff]  ;;  %v82_v48 = vld [vmem:[%s1060_s1 + $0x208] sm:$0xff] }
  0x18   :  { %631 = vmatprep.subr.bf16.mxu1 %v630_v11  ;;  %v640_v45 = vpack.c.bf16 %v64_v41, %v63_v38  ;;  %v99_v49 = vld [vmem:[%s1060_s1 + $0x290] sm:$0xff]  ;;  %v100_v50 = vld [vmem:[%s1060_s1 + $0x298] sm:$0xff]  ;;  %v644_v51 = vpack.c.bf16 %v82_v48, %v81_v47  ;;  %v16_v53 = vld [vmem:[%s1059_s0 + $0x8] sm:$0x3f] }
  0x19   :  { %601 = vmatpush3.bf16.msra.mxu0 %v600_v16  ;;  %300 = vmatprep.mubr.f32.mxu1 %v140_v39  ;;  %v83_v52 = vld [vmem:[%s1060_s1 + $0x210] sm:$0xff]  ;;  %v113_v54 = vld [vmem:[%s1060_s1 + $0x300] sm:$0xff]  ;;  %v646_v55 = vpack.c.bf16 %v100_v50, %v99_v49  ;;  %v84_v56 = vld [vmem:[%s1060_s1 + $0x218] sm:$0xff]  ;;  %v141_v57 = vcombine.high %v16_v53, %v16_v53  ;;  %v963_v58 = vrot.slane %v16_v53, %v877_v10 }
  0x1a   :  { %603 = vmatprep.subr.bf16.mxu0 %v602_v19  ;;  %v114_v59 = vld [vmem:[%s1060_s1 + $0x308] sm:$0xff] }
  0x1b   :  { %633 = vmatpush3.bf16.msra.mxu1 %v632_v17 }
  0x1c   :  { %635 = vmatprep.subr.bf16.mxu1 %v634_v25 }
  0x1d   :  { %605 = vmatpush3.bf16.msra.mxu0 %v604_v33 }
  0x1e   :  { %607 = vmatprep.subr.bf16.mxu0 %v606_v35 }
  0x1f   :  { %637 = vmatpush3.bf16.msra.mxu1 %v636_v34 }
  0x20   :  { %639 = vmatprep.subr.bf16.mxu1 %v638_v40 }
  0x21   :  { %609 = vmatpush3.bf16.msra.mxu0 %v608_v44 }
  0x22   :  { %643 = vmatprep.subr.bf16.mxu0 %v642_v46 }
  0x23   :  { %641 = vmatpush3.bf16.msra.mxu1 %v640_v45 }
  0x24   :  { %8 = vsyncpa [#allocation3], 0  ;;  %v101_v60 = vld [vmem:[%s1060_s1 + $0x2a0] sm:$0xff]  ;;  %v102_v61 = vld [vmem:[%s1060_s1 + $0x2a8] sm:$0xff]  ;;  %v709_v62 = vmov 0.0|0.0   ;;  %v675_v63 = vpack.c.bf16 %v114_v59, %v113_v54  ;;  %231 = vmatmul.mubr.f32.vlgmr.msra.gmra.mrb[0].mxu0 %v131_v23  ;;  %v156_v0 = vcombine.high %v963_v58, %v963_v58  ;;  %v648_v1 = vpack.c.bf16 %v84_v56, %v83_v52 }
  0x25   :  { %674 = vmatprep.subr.bf16.mxu1 %v709_v62  ;;  %645 = vmatpush3.bf16.msra.mxu0 %v644_v51  ;;  %v650_v2 = vpack.c.bf16 %v102_v61, %v101_v60  ;;  %v85_v3 = vld [vmem:[%s1060_s1 + $0x220] sm:$0xff]  ;;  %v86_v4 = vld [vmem:[%s1060_s1 + $0x228] sm:$0xff]  ;;  %v155_v5 = vrot.slane %v141_v57, %v877_v10  ;;  %v103_v6 = vld [vmem:[%s1060_s1 + $0x2b0] sm:$0xff]  ;;  %vm710_vm0 = vmmov 0   ;;  %v711_v8 = vmov 0.0  }
  0x26   :  { %301 = vmatmul.mubr.f32.vlgmr.msra.gmra.mrb[0].mxu1 %v138_v32  ;;  %647 = vmatprep.subr.bf16.mxu0 %v646_v55  ;;  %v104_v7 = vld [vmem:[%s1060_s1 + $0x2b8] sm:$0xff]  ;;  %vm163_vm1 = vcmask 130048   ;;  %v652_v9 = vpack.c.bf16 %v86_v4, %v85_v3  ;;  %v87_v10 = vld [vmem:[%s1060_s1 + $0x230] sm:$0xff]  ;;  %v105_v13 = vld [vmem:[%s1060_s1 + $0x2c0] sm:$0xff] }
  0x27   :  { %370 = vmatprep.mubr.f32.mxu0 %v156_v0  ;;  %676 = vmatpush3.bf16.msra.mxu1 %v675_v63  ;;  %v654_v11 = vpack.c.bf16 %v104_v7, %v103_v6  ;;  %v88_v12 = vld [vmem:[%s1060_s1 + $0x238] sm:$0xff]  ;;  %v106_v14 = vld [vmem:[%s1060_s1 + $0x2c8] sm:$0xff]  ;;  %v89_v17 = vld [vmem:[%s1060_s1 + $0x240] sm:$0xff] }
  0x28   :  { %575 = vmatprep.mubr.msk.f32.mxu1 %vm710_vm0, %v711_v8  ;;  %v656_v15 = vpack.c.bf16 %v88_v12, %v87_v10  ;;  %v658_v16 = vpack.c.bf16 %v106_v14, %v105_v13  ;;  %v90_v18 = vld [vmem:[%s1060_s1 + $0x248] sm:$0xff]  ;;  %v107_v19 = vld [vmem:[%s1060_s1 + $0x2d0] sm:$0xff]  ;;  %v108_v20 = vld [vmem:[%s1060_s1 + $0x2d8] sm:$0xff] }
  0x29   :  { %649 = vmatpush3.bf16.msra.mxu0 %v648_v1  ;;  %v660_v21 = vpack.c.bf16 %v90_v18, %v89_v17  ;;  %v662_v22 = vpack.c.bf16 %v108_v20, %v107_v19  ;;  %v91_v23 = vld [vmem:[%s1060_s1 + $0x250] sm:$0xff]  ;;  %v92_v24 = vld [vmem:[%s1060_s1 + $0x258] sm:$0xff]  ;;  %v109_v25 = vld [vmem:[%s1060_s1 + $0x2e0] sm:$0xff] }
  0x2a   :  { %651 = vmatprep.subr.bf16.mxu0 %v650_v2  ;;  %576 = vmatmul.mubr.msk.f32.vlgmr.msra.gmra.mrb[2].mxu1 %vm163_vm1, %v155_v5  ;;  %v110_v26 = vld [vmem:[%s1060_s1 + $0x2e8] sm:$0xff]  ;;  %v664_v27 = vpack.c.bf16 %v92_v24, %v91_v23  ;;  %v93_v29 = vld [vmem:[%s1060_s1 + $0x260] sm:$0xff]  ;;  %v111_v31 = vld [vmem:[%s1060_s1 + $0x2f0] sm:$0xff] }
  0x2b   :  { %v666_v28 = vpack.c.bf16 %v110_v26, %v109_v25  ;;  %v94_v30 = vld [vmem:[%s1060_s1 + $0x268] sm:$0xff]  ;;  %v112_v32 = vld [vmem:[%s1060_s1 + $0x2f8] sm:$0xff]  ;;  %v95_v35 = vld [vmem:[%s1060_s1 + $0x270] sm:$0xff] }
  0x2c   :  { %v668_v33 = vpack.c.bf16 %v94_v30, %v93_v29  ;;  %v670_v34 = vpack.c.bf16 %v112_v32, %v111_v31  ;;  %v96_v36 = vld [vmem:[%s1060_s1 + $0x278] sm:$0xff]  ;;  %v461_v39 = vld [vmem:[%s1061_s2] ss:$0 sm:$0xff]  ;;  %s712_s1 = smov [#allocation2]  }
  0x2d   :  { %653 = vmatpush3.bf16.msra.mxu0 %v652_v9  ;;  %v672_v37 = vpack.c.bf16 %v96_v36, %v95_v35  ;;  %s453_s23 = sshll.u32 %s712_s1, 4  ;;  %s454_s23 = int_to_ptr.vmem [resolvable:$true] %s453_s23 }
  0x2e   :  { %655 = vmatprep.subr.bf16.mxu0 %v654_v11  ;;  %s684_s24 = scalar_lea.vmem %s454_s23, 32  ;;  %p689_p1 = scmp.lt.s32.totalorder %s454_s23, %s454_s23 }
  0x2f   :  { %p685_p0 = scmp.ne.s32.totalorder %s454_s23, %s684_s24  ;;  %p690_p2 = scmp.lt.s32.totalorder %s684_s24, %s684_s24 }
  0x31   :  { %657 = vmatpush3.bf16.msra.mxu0 %v656_v15  ;;  %p691_p3 = por %p690_p2, %p689_p1 }
  0x32   :  { %659 = vmatprep.subr.bf16.mxu0 %v658_v16 }
  0x33   :  { %p692_p4 = pnand %p691_p3, %p685_p0 }
  0x35   :  { %661 = vmatpush3.bf16.msra.mxu0 %v660_v21 }
  0x36   :  { %663 = vmatprep.subr.bf16.mxu0 %v662_v22 }
  0x39   :  { %665 = vmatpush3.bf16.msra.mxu0 %v664_v27 }
  0x3a   :  { %667 = vmatprep.subr.bf16.mxu0 %v666_v28 }
  0x3d   :  { %669 = vmatpush3.bf16.msra.mxu0 %v668_v33 }
  0x3e   :  { %671 = vmatprep.subr.bf16.mxu0 %v670_v34 }
  0x41   :  { %673 = vmatpush3.bf16.msra.mxu0 %v672_v37 }
  0x44   :  { %371 = vmatmul.mubr.f32.vlgmr.msra.gmra.mrb[2].mxu0 %v963_v58 }
  0xf7   :  { %v495_v38 = vpop.f32.mrb[0].mxu0 }
  0xf8   :  { %v496_v40 = vpop.f32.mrb[1].mxu0 }
  0xf9   :  { %v530_v41 = vpop.f32.mrb[0].mxu1  ;;  %v497_v42 = vadd.f32 %v496_v40, %v495_v38 }
  0xfa   :  { %v531_v43 = vpop.f32.mrb[1].mxu1 }
  0xfb   :  { %v532_v44 = vadd.f32 %v531_v43, %v530_v41  ;;  %v233_v45 = vadd.f32 %v497_v42, %v461_v39 }
  0xfd   :  { %v303_v46 = vadd.f32 %v532_v44, %v233_v45  ;;  %v442_v47 = vpop.f32.mrb[2].mxu1 }
  0xfe   :  { %v577_v48 = vpop.f32.mrb[3].mxu1 }
 0x117   :  { %v565_v49 = vpop.f32.mrb[2].mxu0 }
 0x118   :  { %v566_v50 = vpop.f32.mrb[3].mxu0 }
 0x119   :  { %v567_v51 = vadd.f32 %v566_v50, %v565_v49 }
 0x11b   :  { %v373_v52 = vadd.f32 %v567_v51, %v303_v46 }
 0x11d   :  { %v443_v53 = vadd.f32 %v442_v47, %v373_v52 }
 0x11f   :  { %446 = vst [vmem:[#allocation2] sm:$0x3] %v443_v53 }
 0x120   :  { %695 = shalt.err (!%p692_p4)
}
 0x121   :  { %s696_s26 = scalar_lea.hbm %s1062_s3, 32 }
 0x122   :  { %p697_p5 = scmp.ne.s32.totalorder %s1062_s3, %s696_s26  ;;  %p700_p6 = scmp.lt.u32.totalorder %s696_s26, %s1062_s3 }
 0x124   :  { %p702_p7 = pnand %p700_p6, %p697_p5 }
 0x126   :  { %705 = shalt.err (!%p702_p7)
}
 0x127   :  { %456 = dma.vmem_to_hbm [thread:$0]  %s454_s23, 32, %s1062_s3, [#allocation3]  }
 0x128   :  { %706 = dma.done.wait [#allocation3], 32  }
 0x129   :  { %707 = vsyncadd [#allocation3], 4294967264 }
 0x12a   :  { %460 = vsyncpa [#allocation3], 1 }

</bundles_post_ra>
